<compile_context>
chip_gen: v5e
topology: v5e:2x2
jax: 0.10.0
libtpu: 0.0.40
codegen_flags: <defaults>
</compile_context>

<pallas_src>
import functools

import jax
import jax.numpy as jnp
from jax.experimental import pallas as pl
from jax.experimental.pallas import tpu as pltpu


def _round_up(x, m):
    return ((x + m - 1) // m) * m


def _vmem_budget_bytes():
    """Usable VMEM per TensorCore minus ~12.5% headroom for compiler scratch."""
    try:
        cap = int(pltpu.get_tpu_info().vmem_capacity_bytes)
    except Exception:
        cap = 64 * 1024 * 1024          # conservative (v7x-sized) default
    return cap - cap // 8               # ~56 MiB on v7x, ~112 MiB on v5e/v6e


_ACTIVATIONS = {
    "relu": lambda x: jnp.maximum(x, 0.0),
    "tanh": jnp.tanh,
    "sigmoid": jax.nn.sigmoid,
    "gelu": lambda x: jax.nn.gelu(x, approximate=True),
    "lrelu": lambda x: jax.nn.leaky_relu(x, 0.01),
}


# --------------------------- kernels ---------------------------------------

def _map_encoder_resident_kernel(*refs, n_blocks, residual, compute_dtype, actfun):
    """One batch tile of the whole MAPEncoder; all block weights VMEM-resident.

    refs = (x, w1_0, w2_0, ..., w1_{n-1}, w2_{n-1}, bias_stack, out)
    """
    act = _ACTIVATIONS[actfun]
    x_ref = refs[0]
    w_refs = refs[1:1 + 2 * n_blocks]
    b_ref = refs[1 + 2 * n_blocks]
    o_ref = refs[2 + 2 * n_blocks]

    b_all = b_ref[...]                        # (2*n_blocks, h_p) f32
    h = x_ref[...]                            # native dtype; cast once per dot
    for blk in range(n_blocks):
        w1 = w_refs[2 * blk]
        w2 = w_refs[2 * blk + 1]
        a = jnp.dot(h.astype(compute_dtype), w1[...],
                    preferred_element_type=jnp.float32) + b_all[2 * blk]
        a = act(a)
        a = jnp.dot(a.astype(compute_dtype), w2[...],
                    preferred_element_type=jnp.float32) + b_all[2 * blk + 1]
        a = act(a)
        if residual and blk > 0:
            h = a + h                         # residual add in f32
        else:
            h = a
    o_ref[...] = h.astype(o_ref.dtype)


def _map_encoder_stream_kernel(x_ref, w1_ref, w2_ref, b_ref, o_ref, h_scr, *,
                               residual, compute_dtype, actfun, h_p):
    """Weight-streaming path: grid = (batch tiles, n_blocks); weights are
    streamed per block, activation carried across blocks in VMEM scratch."""
    act = _ACTIVATIONS[actfun]
    blk = pl.program_id(1)
    last = pl.num_programs(1) - 1

    @pl.when(blk == 0)
    def _():
        h_scr[...] = x_ref[...].astype(jnp.float32)

    h = h_scr[...]                            # (tb, d_p) f32
    b_pair = b_ref[0]                         # (2, h_p) f32
    a = jnp.dot(h.astype(compute_dtype), w1_ref[0],
                preferred_element_type=jnp.float32) + b_pair[0]
    a = act(a)
    a = jnp.dot(a.astype(compute_dtype), w2_ref[0],
                preferred_element_type=jnp.float32) + b_pair[1]
    a = act(a)
    if residual:
        prev = h[:, :h_p]
        a = a + jnp.where(blk > 0, prev, jnp.zeros_like(prev))
    h_scr[:, :h_p] = a

    @pl.when(blk == last)
    def _():
        o_ref[...] = a.astype(o_ref.dtype)


# --------------------------- parameter preparation --------------------------

def prepare_map_encoder_params(params, *, compute_dtype=jnp.bfloat16,
                               residual=True, actfun="relu", force_stream=False):
    """Pad / cast / stack the weights ONCE so forward() adds no per-call
    weight HBM traffic. params: list of (w1, b1, w2, b2), w as (d_in, d_out).

    bf16 compute_dtype quantizes weights at rest (intended); biases stay f32.
    """
    n_blocks = len(params)
    in_dim = params[0][0].shape[0]
    h_dim = params[0][2].shape[1]
    din_p = _round_up(in_dim, 128)
    h_p = _round_up(h_dim, 128)
    w_itemsize = jnp.dtype(compute_dtype).itemsize

    resident_w_bytes = ((din_p * h_p + h_p * h_p)
                        + max(n_blocks - 1, 0) * 2 * h_p * h_p) * w_itemsize
    budget = _vmem_budget_bytes()
    # Keep ~16 MiB for double-buffered activation tiles at large tb.
    stream = force_stream or (resident_w_bytes > budget - 16 * 1024 * 1024)

    prep = dict(mode="stream" if stream else "resident",
                compute_dtype=compute_dtype, residual=residual, actfun=actfun,
                in_dim=in_dim, h_dim=h_dim, n_blocks=n_blocks,
                din_p=din_p, h_p=h_p)

    if not stream:
        ws = []
        biases = jnp.zeros((2 * n_blocks, h_p), jnp.float32)
        d_in_p = din_p
        for blk, (w1, b1, w2, b2) in enumerate(params):
            w1p = jnp.zeros((d_in_p, h_p), compute_dtype)
            w1p = w1p.at[:w1.shape[0], :w1.shape[1]].set(w1.astype(compute_dtype))
            w2p = jnp.zeros((h_p, h_p), compute_dtype)
            w2p = w2p.at[:w2.shape[0], :w2.shape[1]].set(w2.astype(compute_dtype))
            ws += [w1p, w2p]
            biases = biases.at[2 * blk, :b1.shape[0]].set(b1.astype(jnp.float32))
            biases = biases.at[2 * blk + 1, :b2.shape[0]].set(b2.astype(jnp.float32))
            d_in_p = h_p
        prep["weights"] = ws
        prep["bias"] = biases
        prep["weight_bytes"] = resident_w_bytes + 2 * n_blocks * h_p * 4
    else:
        d_p = max(din_p, h_p)
        w1s = jnp.zeros((n_blocks, d_p, h_p), compute_dtype)
        w2s = jnp.zeros((n_blocks, h_p, h_p), compute_dtype)
        biases = jnp.zeros((n_blocks, 2, h_p), jnp.float32)
        for blk, (w1, b1, w2, b2) in enumerate(params):
            w1s = w1s.at[blk, :w1.shape[0], :w1.shape[1]].set(w1.astype(compute_dtype))
            w2s = w2s.at[blk, :w2.shape[0], :w2.shape[1]].set(w2.astype(compute_dtype))
            biases = biases.at[blk, 0, :b1.shape[0]].set(b1.astype(jnp.float32))
            biases = biases.at[blk, 1, :b2.shape[0]].set(b2.astype(jnp.float32))
        prep["d_p"] = d_p
        prep["w1"] = w1s
        prep["w2"] = w2s
        prep["bias"] = biases
        # Per-step footprint: double-buffered per-block weights + biases.
        prep["weight_bytes"] = 2 * ((d_p * h_p + h_p * h_p) * w_itemsize + 2 * h_p * 4)
    return prep


# --------------------------- tiling choice ----------------------------------

def _choose_tb(B, prep, out_itemsize, x_itemsize, budget):
    din_p, h_p = prep["din_p"], prep["h_p"]
    d_p = prep.get("d_p", max(din_p, h_p))
    b8 = _round_up(max(B, 8), 8)
    tb = min(512, b8)
    # >= 2 grid steps along batch so both v7x TensorCores get work.
    if _round_up(B, tb) // tb < 2 and b8 >= 16:
        tb = _round_up((b8 + 1) // 2, 8)

    def act_bytes(t):
        if prep["mode"] == "resident":
            return (2 * t * (din_p * x_itemsize + h_p * out_itemsize)
                    + 4 * t * h_p * 4)
        return (2 * t * (d_p * x_itemsize + h_p * out_itemsize)
                + t * d_p * 4 + 4 * t * h_p * 4)

    while tb > 8 and prep["weight_bytes"] + act_bytes(tb) > budget:
        tb = max(8, _round_up(tb // 2, 8))
    return max(tb, 8)


# --------------------------- pallas_call builders ----------------------------

def _call_resident(x, prep, tb, b_p, out_dtype, budget, single_buffer_weights):
    B, in_dim = x.shape
    n_blocks = prep["n_blocks"]
    din_p, h_p = prep["din_p"], prep["h_p"]
    compute_dtype = prep["compute_dtype"]
    x_itemsize = jnp.dtype(x.dtype).itemsize
    out_itemsize = jnp.dtype(out_dtype).itemsize

    x_p = jnp.zeros((b_p, din_p), x.dtype).at[:B, :in_dim].set(x)

    # Constant-index weights: single-buffer (Buffered(1)) to halve weight VMEM.
    w_pipe = dict(pipeline_mode=pl.Buffered(1)) if single_buffer_weights else {}

    flat_inputs = [x_p]
    in_specs = [pl.BlockSpec((tb, din_p), lambda i: (i, 0))]
    d_in_p = din_p
    flops = 0
    for blk in range(n_blocks):
        flat_inputs += [prep["weights"][2 * blk], prep["weights"][2 * blk + 1]]
        in_specs += [
            pl.BlockSpec((d_in_p, h_p), lambda i: (0, 0), **w_pipe),
            pl.BlockSpec((h_p, h_p), lambda i: (0, 0), **w_pipe),
        ]
        flops += 2 * b_p * (d_in_p * h_p + h_p * h_p)
        d_in_p = h_p
    flat_inputs.append(prep["bias"])
    in_specs.append(pl.BlockSpec((2 * n_blocks, h_p), lambda i: (0, 0), **w_pipe))

    weight_bytes = prep["weight_bytes"]
    act_bytes = b_p * (din_p * x_itemsize + h_p * out_itemsize)
    cost = pl.CostEstimate(flops=int(flops), transcendentals=0,
                           bytes_accessed=int(weight_bytes + act_bytes))

    wbuf = 1 if single_buffer_weights else 2
    vmem_needed = (wbuf * weight_bytes
                   + 2 * tb * (din_p * x_itemsize + h_p * out_itemsize)
                   + 4 * tb * h_p * 4)
    vmem_limit = int(min(budget, max(32 * 1024 * 1024, 2 * vmem_needed)))

    kernel = functools.partial(_map_encoder_resident_kernel,
                               n_blocks=n_blocks, residual=prep["residual"],
                               compute_dtype=compute_dtype, actfun=prep["actfun"])

    return pl.pallas_call(
        kernel,
        out_shape=jax.ShapeDtypeStruct((b_p, h_p), out_dtype),
        grid_spec=pltpu.PrefetchScalarGridSpec(
            num_scalar_prefetch=0,
            grid=(b_p // tb,),
            in_specs=in_specs,
            out_specs=pl.BlockSpec((tb, h_p), lambda i: (i, 0)),
        ),
        compiler_params=pltpu.CompilerParams(
            # NOTE: under megacore "parallel" each TC holds its own weight copy.
            dimension_semantics=("parallel",),
            vmem_limit_bytes=vmem_limit,
        ),
        cost_estimate=cost,
    )(*flat_inputs)


def _call_stream(x, prep, tb, b_p, out_dtype, budget):
    B, in_dim = x.shape
    n_blocks = prep["n_blocks"]
    d_p, h_p = prep["d_p"], prep["h_p"]
    compute_dtype = prep["compute_dtype"]
    x_itemsize = jnp.dtype(x.dtype).itemsize
    out_itemsize = jnp.dtype(out_dtype).itemsize

    x_p = jnp.zeros((b_p, d_p), x.dtype).at[:B, :in_dim].set(x)

    flops = 2 * b_p * n_blocks * (d_p * h_p + h_p * h_p)
    w_bytes = ((prep["w1"].size + prep["w2"].size) * jnp.dtype(compute_dtype).itemsize
               + prep["bias"].size * 4)
    act_bytes = b_p * (d_p * x_itemsize + h_p * out_itemsize)
    cost = pl.CostEstimate(flops=int(flops), transcendentals=0,
                           bytes_accessed=int(w_bytes * (b_p // tb) + act_bytes))

    vmem_needed = (prep["weight_bytes"]
                   + 2 * tb * (d_p * x_itemsize + h_p * out_itemsize)
                   + tb * d_p * 4 + 4 * tb * h_p * 4)
    vmem_limit = int(min(budget, max(32 * 1024 * 1024, 2 * vmem_needed)))

    kernel = functools.partial(_map_encoder_stream_kernel,
                               residual=prep["residual"],
                               compute_dtype=compute_dtype,
                               actfun=prep["actfun"], h_p=h_p)

    return pl.pallas_call(
        kernel,
        out_shape=jax.ShapeDtypeStruct((b_p, h_p), out_dtype),
        grid_spec=pltpu.PrefetchScalarGridSpec(
            num_scalar_prefetch=0,
            grid=(b_p // tb, n_blocks),
            in_specs=[
                pl.BlockSpec((tb, d_p), lambda i, k: (i, 0)),
                pl.BlockSpec((1, d_p, h_p), lambda i, k: (k, 0, 0)),
                pl.BlockSpec((1, h_p, h_p), lambda i, k: (k, 0, 0)),
                pl.BlockSpec((1, 2, h_p), lambda i, k: (k, 0, 0)),
            ],
            out_specs=pl.BlockSpec((tb, h_p), lambda i, k: (i, 0)),
            scratch_shapes=[pltpu.VMEM((tb, d_p), jnp.float32)],
        ),
        compiler_params=pltpu.CompilerParams(
            dimension_semantics=("parallel", "arbitrary"),
            vmem_limit_bytes=vmem_limit,
        ),
        cost_estimate=cost,
    )(x_p, prep["w1"], prep["w2"], prep["bias"])


# --------------------------- public forward ---------------------------------

def map_encoder_forward(x, prep, *, tb=None, out_dtype=None):
    """MAPEncoder.forward on pre-prepared (padded/cast) params."""
    B, in_dim = x.shape
    if in_dim != prep["in_dim"]:
        raise ValueError(f"x feature dim {in_dim} != prepared in_dim {prep['in_dim']}")
    out_dtype = jnp.dtype(out_dtype) if out_dtype is not None else x.dtype
    budget = _vmem_budget_bytes()
    if tb is None:
        tb = _choose_tb(B, prep, jnp.dtype(out_dtype).itemsize,
                        jnp.dtype(x.dtype).itemsize, budget)
    else:
        tb = max(8, _round_up(min(tb, _round_up(B, 8)), 8))
    b_p = _round_up(B, tb)

    if prep["mode"] == "resident":
        try:
            out_p = _call_resident(x, prep, tb, b_p, out_dtype, budget,
                                   single_buffer_weights=True)
        except Exception:
            # Fallback if this JAX build rejects pl.Buffered(1) single-buffering.
            out_p = _call_resident(x, prep, tb, b_p, out_dtype, budget,
                                   single_buffer_weights=False)
    else:
        out_p = _call_stream(x, prep, tb, b_p, out_dtype, budget)
    return out_p[:B, :prep["h_dim"]]


# ----------------------------- init helpers --------------------------------

def _init_linear(key, fan_in, fan_out, dtype=jnp.float32):
    # Synthetic init mimicking nn.Linear's U(-1/sqrt(fan_in), +1/sqrt(fan_in)).
    kw, kb = jax.random.split(key)
    bound = 1.0 / float(fan_in) ** 0.5
    w = jax.random.uniform(kw, (fan_in, fan_out), dtype, -bound, bound)  # = torch W.T
    b = jax.random.uniform(kb, (fan_out,), dtype, -bound, bound)
    return w, b


def init_map_encoder(key, in_dim, h_dim, n_blocks, dtype=jnp.float32):
    params = []
    d_in = in_dim
    for _ in range(n_blocks):
        key, k1, k2 = jax.random.split(key, 3)
        w1, b1 = _init_linear(k1, d_in, h_dim, dtype)
        w2, b2 = _init_linear(k2, h_dim, h_dim, dtype)
        params.append((w1, b1, w2, b2))
        d_in = h_dim
    return params


if __name__ == "__main__":
    B, in_dim, h_dim, n_blocks = 64, 16, 32, 3
    key = jax.random.PRNGKey(0)
    kx, kp = jax.random.split(key)
    x = jax.random.normal(kx, (B, in_dim), jnp.float32)
    params = init_map_encoder(kp, in_dim, h_dim, n_blocks)

    # Pure-JAX reference (mirrors the PyTorch forward exactly, actfun='relu').
    def ref(x, params):
        h = x
        for i, (w1, b1, w2, b2) in enumerate(params):
            r = h if i > 0 else 0.0
            a = jax.nn.relu(h @ w1 + b1)
            a = jax.nn.relu(a @ w2 + b2)
            h = a + r
        return h

    expected = ref(x, params)

    # 1) f32 resident path: tight-tolerance validation.
    prep_f32 = prepare_map_encoder_params(params, compute_dtype=jnp.float32)
    y = jax.block_until_ready(map_encoder_forward(x, prep_f32))
    assert y.shape == (B, h_dim)
    assert jnp.allclose(y, expected, atol=1e-5, rtol=1e-5), "f32 kernel mismatch"

    # 2) bf16 resident path (default): bf16 weights/matmuls, f32 accumulation.
    prep_bf16 = prepare_map_encoder_params(params)   # compute_dtype=bf16 default
    y_bf16 = jax.block_until_ready(map_encoder_forward(x, prep_bf16))
    assert y_bf16.shape == (B, h_dim)
    assert jnp.all(jnp.isfinite(y_bf16))
    assert jnp.allclose(y_bf16, expected, atol=1e-1, rtol=1e-1), "bf16 drifted too far"

    # 3) Weight-streaming fallback path (forced on small shapes; f32 for exactness).
    prep_stream = prepare_map_encoder_params(params, compute_dtype=jnp.float32,
                                             force_stream=True)
    y_s = jax.block_until_ready(map_encoder_forward(x, prep_stream))
    assert y_s.shape == (B, h_dim)
    assert jnp.allclose(y_s, expected, atol=1e-5, rtol=1e-5), "stream kernel mismatch"

    print("KERNEL_OK")
</pallas_src>

<mosaic_0001>
module attributes {stable_mosaic.version = 11 : i64} {
  func.func @_map_encoder_resident_kernel(%arg0: i32, %arg1: memref<32x128xf32, #tpu.memory_space<vmem>>, %arg2: memref<128x128xf32, #tpu.memory_space<vmem>>, %arg3: memref<128x128xf32, #tpu.memory_space<vmem>>, %arg4: memref<128x128xf32, #tpu.memory_space<vmem>>, %arg5: memref<128x128xf32, #tpu.memory_space<vmem>>, %arg6: memref<128x128xf32, #tpu.memory_space<vmem>>, %arg7: memref<128x128xf32, #tpu.memory_space<vmem>>, %arg8: memref<6x128xf32, #tpu.memory_space<vmem>>, %arg9: memref<32x128xf32, #tpu.memory_space<vmem>>) attributes {dimension_semantics = [#tpu.dimension_semantics<parallel>], iteration_bounds = array<i64: 2>, scalar_prefetch = 0 : i64, scratch_operands = 0 : i64, tpu.core_type = #tpu.core_type<tc>, window_params = [{transform_indices = @transform_0, window_bounds = array<i64: 32, 128>}, {pipeline_mode = #tpu.pipeline_mode<synchronous>, transform_indices = @transform_1, window_bounds = array<i64: 128, 128>}, {pipeline_mode = #tpu.pipeline_mode<synchronous>, transform_indices = @transform_2, window_bounds = array<i64: 128, 128>}, {pipeline_mode = #tpu.pipeline_mode<synchronous>, transform_indices = @transform_3, window_bounds = array<i64: 128, 128>}, {pipeline_mode = #tpu.pipeline_mode<synchronous>, transform_indices = @transform_4, window_bounds = array<i64: 128, 128>}, {pipeline_mode = #tpu.pipeline_mode<synchronous>, transform_indices = @transform_5, window_bounds = array<i64: 128, 128>}, {pipeline_mode = #tpu.pipeline_mode<synchronous>, transform_indices = @transform_6, window_bounds = array<i64: 128, 128>}, {pipeline_mode = #tpu.pipeline_mode<synchronous>, transform_indices = @transform_7, window_bounds = array<i64: 6, 128>}, {transform_indices = @transform_8, window_bounds = array<i64: 32, 128>}]} {
    %c0 = arith.constant 0 : index
    %c0_0 = arith.constant 0 : index
    %0 = vector.load %arg8[%c0, %c0_0] : memref<6x128xf32, #tpu.memory_space<vmem>>, vector<6x128xf32>
    %c0_1 = arith.constant 0 : index
    %c0_2 = arith.constant 0 : index
    %1 = vector.load %arg1[%c0_1, %c0_2] : memref<32x128xf32, #tpu.memory_space<vmem>>, vector<32x128xf32>
    %c0_3 = arith.constant 0 : index
    %c0_4 = arith.constant 0 : index
    %2 = vector.load %arg2[%c0_3, %c0_4] : memref<128x128xf32, #tpu.memory_space<vmem>>, vector<128x128xf32>
    %cst = arith.constant dense<0.000000e+00> : vector<32x128xf32>
    %3 = tpu.matmul %1, %2, %cst {dimension_numbers = #tpu.dot_dimension_numbers<[1], [0], [0], [1], [0, 0, 1, 1], [], []>} : vector<32x128xf32>, vector<128x128xf32>, vector<32x128xf32> -> vector<32x128xf32>
    %4 = vector.extract_strided_slice %0 {offsets = [0, 0], sizes = [1, 128], strides = [1, 1]} : vector<6x128xf32> to vector<1x128xf32>
    %5 = vector.shape_cast %4 : vector<1x128xf32> to vector<128xf32>
    %6 = vector.shape_cast %5 : vector<128xf32> to vector<1x128xf32>
    %7 = vector.broadcast %6 : vector<1x128xf32> to vector<32x128xf32>
    %8 = arith.addf %3, %7 : vector<32x128xf32>
    %cst_5 = arith.constant 0.000000e+00 : f32
    %9 = vector.broadcast %cst_5 : f32 to vector<32x128xf32>
    %10 = arith.maximumf %8, %9 : vector<32x128xf32>
    %c0_6 = arith.constant 0 : index
    %c0_7 = arith.constant 0 : index
    %11 = vector.load %arg3[%c0_6, %c0_7] : memref<128x128xf32, #tpu.memory_space<vmem>>, vector<128x128xf32>
    %cst_8 = arith.constant dense<0.000000e+00> : vector<32x128xf32>
    %12 = tpu.matmul %10, %11, %cst_8 {dimension_numbers = #tpu.dot_dimension_numbers<[1], [0], [0], [1], [0, 0, 1, 1], [], []>} : vector<32x128xf32>, vector<128x128xf32>, vector<32x128xf32> -> vector<32x128xf32>
    %13 = vector.extract_strided_slice %0 {offsets = [1, 0], sizes = [1, 128], strides = [1, 1]} : vector<6x128xf32> to vector<1x128xf32>
    %14 = vector.shape_cast %13 : vector<1x128xf32> to vector<128xf32>
    %15 = vector.shape_cast %14 : vector<128xf32> to vector<1x128xf32>
    %16 = vector.broadcast %15 : vector<1x128xf32> to vector<32x128xf32>
    %17 = arith.addf %12, %16 : vector<32x128xf32>
    %cst_9 = arith.constant 0.000000e+00 : f32
    %18 = vector.broadcast %cst_9 : f32 to vector<32x128xf32>
    %19 = arith.maximumf %17, %18 : vector<32x128xf32>
    %c0_10 = arith.constant 0 : index
    %c0_11 = arith.constant 0 : index
    %20 = vector.load %arg4[%c0_10, %c0_11] : memref<128x128xf32, #tpu.memory_space<vmem>>, vector<128x128xf32>
    %cst_12 = arith.constant dense<0.000000e+00> : vector<32x128xf32>
    %21 = tpu.matmul %19, %20, %cst_12 {dimension_numbers = #tpu.dot_dimension_numbers<[1], [0], [0], [1], [0, 0, 1, 1], [], []>} : vector<32x128xf32>, vector<128x128xf32>, vector<32x128xf32> -> vector<32x128xf32>
    %22 = vector.extract_strided_slice %0 {offsets = [2, 0], sizes = [1, 128], strides = [1, 1]} : vector<6x128xf32> to vector<1x128xf32>
    %23 = vector.shape_cast %22 : vector<1x128xf32> to vector<128xf32>
    %24 = vector.shape_cast %23 : vector<128xf32> to vector<1x128xf32>
    %25 = vector.broadcast %24 : vector<1x128xf32> to vector<32x128xf32>
    %26 = arith.addf %21, %25 : vector<32x128xf32>
    %cst_13 = arith.constant 0.000000e+00 : f32
    %27 = vector.broadcast %cst_13 : f32 to vector<32x128xf32>
    %28 = arith.maximumf %26, %27 : vector<32x128xf32>
    %c0_14 = arith.constant 0 : index
    %c0_15 = arith.constant 0 : index
    %29 = vector.load %arg5[%c0_14, %c0_15] : memref<128x128xf32, #tpu.memory_space<vmem>>, vector<128x128xf32>
    %cst_16 = arith.constant dense<0.000000e+00> : vector<32x128xf32>
    %30 = tpu.matmul %28, %29, %cst_16 {dimension_numbers = #tpu.dot_dimension_numbers<[1], [0], [0], [1], [0, 0, 1, 1], [], []>} : vector<32x128xf32>, vector<128x128xf32>, vector<32x128xf32> -> vector<32x128xf32>
    %31 = vector.extract_strided_slice %0 {offsets = [3, 0], sizes = [1, 128], strides = [1, 1]} : vector<6x128xf32> to vector<1x128xf32>
    %32 = vector.shape_cast %31 : vector<1x128xf32> to vector<128xf32>
    %33 = vector.shape_cast %32 : vector<128xf32> to vector<1x128xf32>
    %34 = vector.broadcast %33 : vector<1x128xf32> to vector<32x128xf32>
    %35 = arith.addf %30, %34 : vector<32x128xf32>
    %cst_17 = arith.constant 0.000000e+00 : f32
    %36 = vector.broadcast %cst_17 : f32 to vector<32x128xf32>
    %37 = arith.maximumf %35, %36 : vector<32x128xf32>
    %38 = arith.addf %37, %19 : vector<32x128xf32>
    %c0_18 = arith.constant 0 : index
    %c0_19 = arith.constant 0 : index
    %39 = vector.load %arg6[%c0_18, %c0_19] : memref<128x128xf32, #tpu.memory_space<vmem>>, vector<128x128xf32>
    %cst_20 = arith.constant dense<0.000000e+00> : vector<32x128xf32>
    %40 = tpu.matmul %38, %39, %cst_20 {dimension_numbers = #tpu.dot_dimension_numbers<[1], [0], [0], [1], [0, 0, 1, 1], [], []>} : vector<32x128xf32>, vector<128x128xf32>, vector<32x128xf32> -> vector<32x128xf32>
    %41 = vector.extract_strided_slice %0 {offsets = [4, 0], sizes = [1, 128], strides = [1, 1]} : vector<6x128xf32> to vector<1x128xf32>
    %42 = vector.shape_cast %41 : vector<1x128xf32> to vector<128xf32>
    %43 = vector.shape_cast %42 : vector<128xf32> to vector<1x128xf32>
    %44 = vector.broadcast %43 : vector<1x128xf32> to vector<32x128xf32>
    %45 = arith.addf %40, %44 : vector<32x128xf32>
    %cst_21 = arith.constant 0.000000e+00 : f32
    %46 = vector.broadcast %cst_21 : f32 to vector<32x128xf32>
    %47 = arith.maximumf %45, %46 : vector<32x128xf32>
    %c0_22 = arith.constant 0 : index
    %c0_23 = arith.constant 0 : index
    %48 = vector.load %arg7[%c0_22, %c0_23] : memref<128x128xf32, #tpu.memory_space<vmem>>, vector<128x128xf32>
    %cst_24 = arith.constant dense<0.000000e+00> : vector<32x128xf32>
    %49 = tpu.matmul %47, %48, %cst_24 {dimension_numbers = #tpu.dot_dimension_numbers<[1], [0], [0], [1], [0, 0, 1, 1], [], []>} : vector<32x128xf32>, vector<128x128xf32>, vector<32x128xf32> -> vector<32x128xf32>
    %50 = vector.extract_strided_slice %0 {offsets = [5, 0], sizes = [1, 128], strides = [1, 1]} : vector<6x128xf32> to vector<1x128xf32>
    %51 = vector.shape_cast %50 : vector<1x128xf32> to vector<128xf32>
    %52 = vector.shape_cast %51 : vector<128xf32> to vector<1x128xf32>
    %53 = vector.broadcast %52 : vector<1x128xf32> to vector<32x128xf32>
    %54 = arith.addf %49, %53 : vector<32x128xf32>
    %cst_25 = arith.constant 0.000000e+00 : f32
    %55 = vector.broadcast %cst_25 : f32 to vector<32x128xf32>
    %56 = arith.maximumf %54, %55 : vector<32x128xf32>
    %57 = arith.addf %56, %38 : vector<32x128xf32>
    %c0_26 = arith.constant 0 : index
    %c0_27 = arith.constant 0 : index
    %58 = vector.load %arg9[%c0_26, %c0_27] : memref<32x128xf32, #tpu.memory_space<vmem>>, vector<32x128xf32>
    tpu.vector_store %arg9[%c0_26, %c0_27], %57 {strides = array<i32>} : memref<32x128xf32, #tpu.memory_space<vmem>>, vector<32x128xf32>,
    return
  }
  func.func @transform_0(%arg0: i32) -> (i32, i32) {
    %c0_i32 = arith.constant 0 : i32
    %c0_i32_0 = arith.constant 0 : i32
    return %arg0, %c0_i32 : i32, i32
  }
  func.func @transform_1(%arg0: i32) -> (i32, i32) {
    %c0_i32 = arith.constant 0 : i32
    %c0_i32_0 = arith.constant 0 : i32
    %c0_i32_1 = arith.constant 0 : i32
    return %c0_i32, %c0_i32_0 : i32, i32
  }
  func.func @transform_2(%arg0: i32) -> (i32, i32) {
    %c0_i32 = arith.constant 0 : i32
    %c0_i32_0 = arith.constant 0 : i32
    %c0_i32_1 = arith.constant 0 : i32
    return %c0_i32, %c0_i32_0 : i32, i32
  }
  func.func @transform_3(%arg0: i32) -> (i32, i32) {
    %c0_i32 = arith.constant 0 : i32
    %c0_i32_0 = arith.constant 0 : i32
    %c0_i32_1 = arith.constant 0 : i32
    return %c0_i32, %c0_i32_0 : i32, i32
  }
  func.func @transform_4(%arg0: i32) -> (i32, i32) {
    %c0_i32 = arith.constant 0 : i32
    %c0_i32_0 = arith.constant 0 : i32
    %c0_i32_1 = arith.constant 0 : i32
    return %c0_i32, %c0_i32_0 : i32, i32
  }
  func.func @transform_5(%arg0: i32) -> (i32, i32) {
    %c0_i32 = arith.constant 0 : i32
    %c0_i32_0 = arith.constant 0 : i32
    %c0_i32_1 = arith.constant 0 : i32
    return %c0_i32, %c0_i32_0 : i32, i32
  }
  func.func @transform_6(%arg0: i32) -> (i32, i32) {
    %c0_i32 = arith.constant 0 : i32
    %c0_i32_0 = arith.constant 0 : i32
    %c0_i32_1 = arith.constant 0 : i32
    return %c0_i32, %c0_i32_0 : i32, i32
  }
  func.func @transform_7(%arg0: i32) -> (i32, i32) {
    %c0_i32 = arith.constant 0 : i32
    %c0_i32_0 = arith.constant 0 : i32
    %c0_i32_1 = arith.constant 0 : i32
    return %c0_i32, %c0_i32_0 : i32, i32
  }
  func.func @transform_8(%arg0: i32) -> (i32, i32) {
    %c0_i32 = arith.constant 0 : i32
    %c0_i32_0 = arith.constant 0 : i32
    return %arg0, %c0_i32 : i32, i32
  }
}

module attributes {stable_mosaic.version = 11 : i64} {
  func.func @_map_encoder_resident_kernel(%arg0: i32, %arg1: memref<32x128xf32, #tpu.memory_space<vmem>>, %arg2: memref<128x128xf32, #tpu.memory_space<vmem>>, %arg3: memref<128x128xf32, #tpu.memory_space<vmem>>, %arg4: memref<128x128xf32, #tpu.memory_space<vmem>>, %arg5: memref<128x128xf32, #tpu.memory_space<vmem>>, %arg6: memref<128x128xf32, #tpu.memory_space<vmem>>, %arg7: memref<128x128xf32, #tpu.memory_space<vmem>>, %arg8: memref<6x128xf32, #tpu.memory_space<vmem>>, %arg9: memref<32x128xf32, #tpu.memory_space<vmem>>) attributes {dimension_semantics = [#tpu.dimension_semantics<parallel>], iteration_bounds = array<i64: 2>, scalar_prefetch = 0 : i64, scratch_operands = 0 : i64, tpu.core_type = #tpu.core_type<tc>, window_params = [{transform_indices = @transform_0, window_bounds = array<i64: 32, 128>}, {pipeline_mode = #tpu.pipeline_mode<synchronous>, transform_indices = @transform_1, window_bounds = array<i64: 128, 128>}, {pipeline_mode = #tpu.pipeline_mode<synchronous>, transform_indices = @transform_2, window_bounds = array<i64: 128, 128>}, {pipeline_mode = #tpu.pipeline_mode<synchronous>, transform_indices = @transform_3, window_bounds = array<i64: 128, 128>}, {pipeline_mode = #tpu.pipeline_mode<synchronous>, transform_indices = @transform_4, window_bounds = array<i64: 128, 128>}, {pipeline_mode = #tpu.pipeline_mode<synchronous>, transform_indices = @transform_5, window_bounds = array<i64: 128, 128>}, {pipeline_mode = #tpu.pipeline_mode<synchronous>, transform_indices = @transform_6, window_bounds = array<i64: 128, 128>}, {pipeline_mode = #tpu.pipeline_mode<synchronous>, transform_indices = @transform_7, window_bounds = array<i64: 6, 128>}, {transform_indices = @transform_8, window_bounds = array<i64: 32, 128>}]} {
    %c0 = arith.constant 0 : index
    %c0_0 = arith.constant 0 : index
    %0 = vector.load %arg8[%c0, %c0_0] : memref<6x128xf32, #tpu.memory_space<vmem>>, vector<6x128xf32>
    %c0_1 = arith.constant 0 : index
    %c0_2 = arith.constant 0 : index
    %1 = vector.load %arg1[%c0_1, %c0_2] : memref<32x128xf32, #tpu.memory_space<vmem>>, vector<32x128xf32>
    %c0_3 = arith.constant 0 : index
    %c0_4 = arith.constant 0 : index
    %2 = vector.load %arg2[%c0_3, %c0_4] : memref<128x128xf32, #tpu.memory_space<vmem>>, vector<128x128xf32>
    %cst = arith.constant dense<0.000000e+00> : vector<32x128xf32>
    %3 = tpu.matmul %1, %2, %cst {dimension_numbers = #tpu.dot_dimension_numbers<[1], [0], [0], [1], [0, 0, 1, 1], [], []>} : vector<32x128xf32>, vector<128x128xf32>, vector<32x128xf32> -> vector<32x128xf32>
    %4 = vector.extract_strided_slice %0 {offsets = [0, 0], sizes = [1, 128], strides = [1, 1]} : vector<6x128xf32> to vector<1x128xf32>
    %5 = vector.shape_cast %4 : vector<1x128xf32> to vector<128xf32>
    %6 = vector.shape_cast %5 : vector<128xf32> to vector<1x128xf32>
    %7 = vector.broadcast %6 : vector<1x128xf32> to vector<32x128xf32>
    %8 = arith.addf %3, %7 : vector<32x128xf32>
    %cst_5 = arith.constant 0.000000e+00 : f32
    %9 = vector.broadcast %cst_5 : f32 to vector<32x128xf32>
    %10 = arith.maximumf %8, %9 : vector<32x128xf32>
    %c0_6 = arith.constant 0 : index
    %c0_7 = arith.constant 0 : index
    %11 = vector.load %arg3[%c0_6, %c0_7] : memref<128x128xf32, #tpu.memory_space<vmem>>, vector<128x128xf32>
    %cst_8 = arith.constant dense<0.000000e+00> : vector<32x128xf32>
    %12 = tpu.matmul %10, %11, %cst_8 {dimension_numbers = #tpu.dot_dimension_numbers<[1], [0], [0], [1], [0, 0, 1, 1], [], []>} : vector<32x128xf32>, vector<128x128xf32>, vector<32x128xf32> -> vector<32x128xf32>
    %13 = vector.extract_strided_slice %0 {offsets = [1, 0], sizes = [1, 128], strides = [1, 1]} : vector<6x128xf32> to vector<1x128xf32>
    %14 = vector.shape_cast %13 : vector<1x128xf32> to vector<128xf32>
    %15 = vector.shape_cast %14 : vector<128xf32> to vector<1x128xf32>
    %16 = vector.broadcast %15 : vector<1x128xf32> to vector<32x128xf32>
    %17 = arith.addf %12, %16 : vector<32x128xf32>
    %cst_9 = arith.constant 0.000000e+00 : f32
    %18 = vector.broadcast %cst_9 : f32 to vector<32x128xf32>
    %19 = arith.maximumf %17, %18 : vector<32x128xf32>
    %c0_10 = arith.constant 0 : index
    %c0_11 = arith.constant 0 : index
    %20 = vector.load %arg4[%c0_10, %c0_11] : memref<128x128xf32, #tpu.memory_space<vmem>>, vector<128x128xf32>
    %cst_12 = arith.constant dense<0.000000e+00> : vector<32x128xf32>
    %21 = tpu.matmul %19, %20, %cst_12 {dimension_numbers = #tpu.dot_dimension_numbers<[1], [0], [0], [1], [0, 0, 1, 1], [], []>} : vector<32x128xf32>, vector<128x128xf32>, vector<32x128xf32> -> vector<32x128xf32>
    %22 = vector.extract_strided_slice %0 {offsets = [2, 0], sizes = [1, 128], strides = [1, 1]} : vector<6x128xf32> to vector<1x128xf32>
    %23 = vector.shape_cast %22 : vector<1x128xf32> to vector<128xf32>
    %24 = vector.shape_cast %23 : vector<128xf32> to vector<1x128xf32>
    %25 = vector.broadcast %24 : vector<1x128xf32> to vector<32x128xf32>
    %26 = arith.addf %21, %25 : vector<32x128xf32>
    %cst_13 = arith.constant 0.000000e+00 : f32
    %27 = vector.broadcast %cst_13 : f32 to vector<32x128xf32>
    %28 = arith.maximumf %26, %27 : vector<32x128xf32>
    %c0_14 = arith.constant 0 : index
    %c0_15 = arith.constant 0 : index
    %29 = vector.load %arg5[%c0_14, %c0_15] : memref<128x128xf32, #tpu.memory_space<vmem>>, vector<128x128xf32>
    %cst_16 = arith.constant dense<0.000000e+00> : vector<32x128xf32>
    %30 = tpu.matmul %28, %29, %cst_16 {dimension_numbers = #tpu.dot_dimension_numbers<[1], [0], [0], [1], [0, 0, 1, 1], [], []>} : vector<32x128xf32>, vector<128x128xf32>, vector<32x128xf32> -> vector<32x128xf32>
    %31 = vector.extract_strided_slice %0 {offsets = [3, 0], sizes = [1, 128], strides = [1, 1]} : vector<6x128xf32> to vector<1x128xf32>
    %32 = vector.shape_cast %31 : vector<1x128xf32> to vector<128xf32>
    %33 = vector.shape_cast %32 : vector<128xf32> to vector<1x128xf32>
    %34 = vector.broadcast %33 : vector<1x128xf32> to vector<32x128xf32>
    %35 = arith.addf %30, %34 : vector<32x128xf32>
    %cst_17 = arith.constant 0.000000e+00 : f32
    %36 = vector.broadcast %cst_17 : f32 to vector<32x128xf32>
    %37 = arith.maximumf %35, %36 : vector<32x128xf32>
    %38 = arith.addf %37, %19 : vector<32x128xf32>
    %c0_18 = arith.constant 0 : index
    %c0_19 = arith.constant 0 : index
    %39 = vector.load %arg6[%c0_18, %c0_19] : memref<128x128xf32, #tpu.memory_space<vmem>>, vector<128x128xf32>
    %cst_20 = arith.constant dense<0.000000e+00> : vector<32x128xf32>
    %40 = tpu.matmul %38, %39, %cst_20 {dimension_numbers = #tpu.dot_dimension_numbers<[1], [0], [0], [1], [0, 0, 1, 1], [], []>} : vector<32x128xf32>, vector<128x128xf32>, vector<32x128xf32> -> vector<32x128xf32>
    %41 = vector.extract_strided_slice %0 {offsets = [4, 0], sizes = [1, 128], strides = [1, 1]} : vector<6x128xf32> to vector<1x128xf32>
    %42 = vector.shape_cast %41 : vector<1x128xf32> to vector<128xf32>
    %43 = vector.shape_cast %42 : vector<128xf32> to vector<1x128xf32>
    %44 = vector.broadcast %43 : vector<1x128xf32> to vector<32x128xf32>
    %45 = arith.addf %40, %44 : vector<32x128xf32>
    %cst_21 = arith.constant 0.000000e+00 : f32
    %46 = vector.broadcast %cst_21 : f32 to vector<32x128xf32>
    %47 = arith.maximumf %45, %46 : vector<32x128xf32>
    %c0_22 = arith.constant 0 : index
    %c0_23 = arith.constant 0 : index
    %48 = vector.load %arg7[%c0_22, %c0_23] : memref<128x128xf32, #tpu.memory_space<vmem>>, vector<128x128xf32>
    %cst_24 = arith.constant dense<0.000000e+00> : vector<32x128xf32>
    %49 = tpu.matmul %47, %48, %cst_24 {dimension_numbers = #tpu.dot_dimension_numbers<[1], [0], [0], [1], [0, 0, 1, 1], [], []>} : vector<32x128xf32>, vector<128x128xf32>, vector<32x128xf32> -> vector<32x128xf32>
    %50 = vector.extract_strided_slice %0 {offsets = [5, 0], sizes = [1, 128], strides = [1, 1]} : vector<6x128xf32> to vector<1x128xf32>
    %51 = vector.shape_cast %50 : vector<1x128xf32> to vector<128xf32>
    %52 = vector.shape_cast %51 : vector<128xf32> to vector<1x128xf32>
    %53 = vector.broadcast %52 : vector<1x128xf32> to vector<32x128xf32>
    %54 = arith.addf %49, %53 : vector<32x128xf32>
    %cst_25 = arith.constant 0.000000e+00 : f32
    %55 = vector.broadcast %cst_25 : f32 to vector<32x128xf32>
    %56 = arith.maximumf %54, %55 : vector<32x128xf32>
    %57 = arith.addf %56, %38 : vector<32x128xf32>
    %c0_26 = arith.constant 0 : index
    %c0_27 = arith.constant 0 : index
    %58 = vector.load %arg9[%c0_26, %c0_27] : memref<32x128xf32, #tpu.memory_space<vmem>>, vector<32x128xf32>
    tpu.vector_store %arg9[%c0_26, %c0_27], %57 {strides = array<i32>} : memref<32x128xf32, #tpu.memory_space<vmem>>, vector<32x128xf32>,
    return
  }
  func.func @transform_0(%arg0: i32) -> (i32, i32) {
    %c0_i32 = arith.constant 0 : i32
    %c0_i32_0 = arith.constant 0 : i32
    return %arg0, %c0_i32 : i32, i32
  }
  func.func @transform_1(%arg0: i32) -> (i32, i32) {
    %c0_i32 = arith.constant 0 : i32
    %c0_i32_0 = arith.constant 0 : i32
    %c0_i32_1 = arith.constant 0 : i32
    return %c0_i32, %c0_i32_0 : i32, i32
  }
  func.func @transform_2(%arg0: i32) -> (i32, i32) {
    %c0_i32 = arith.constant 0 : i32
    %c0_i32_0 = arith.constant 0 : i32
    %c0_i32_1 = arith.constant 0 : i32
    return %c0_i32, %c0_i32_0 : i32, i32
  }
  func.func @transform_3(%arg0: i32) -> (i32, i32) {
    %c0_i32 = arith.constant 0 : i32
    %c0_i32_0 = arith.constant 0 : i32
    %c0_i32_1 = arith.constant 0 : i32
    return %c0_i32, %c0_i32_0 : i32, i32
  }
  func.func @transform_4(%arg0: i32) -> (i32, i32) {
    %c0_i32 = arith.constant 0 : i32
    %c0_i32_0 = arith.constant 0 : i32
    %c0_i32_1 = arith.constant 0 : i32
    return %c0_i32, %c0_i32_0 : i32, i32
  }
  func.func @transform_5(%arg0: i32) -> (i32, i32) {
    %c0_i32 = arith.constant 0 : i32
    %c0_i32_0 = arith.constant 0 : i32
    %c0_i32_1 = arith.constant 0 : i32
    return %c0_i32, %c0_i32_0 : i32, i32
  }
  func.func @transform_6(%arg0: i32) -> (i32, i32) {
    %c0_i32 = arith.constant 0 : i32
    %c0_i32_0 = arith.constant 0 : i32
    %c0_i32_1 = arith.constant 0 : i32
    return %c0_i32, %c0_i32_0 : i32, i32
  }
  func.func @transform_7(%arg0: i32) -> (i32, i32) {
    %c0_i32 = arith.constant 0 : i32
    %c0_i32_0 = arith.constant 0 : i32
    %c0_i32_1 = arith.constant 0 : i32
    return %c0_i32, %c0_i32_0 : i32, i32
  }
  func.func @transform_8(%arg0: i32) -> (i32, i32) {
    %c0_i32 = arith.constant 0 : i32
    %c0_i32_0 = arith.constant 0 : i32
    return %arg0, %c0_i32 : i32, i32
  }
}

</mosaic_0001>

<bundles_post_ra>
// kernel: tpu_custom_call.1
= control target key start
LH: loop header
LB: loop body
LE: loop exit
PB: predicated region body
PF: predicated region fallthrough
CT: control target
= control target key end

     0   :  { %s1737_s0 = inlined_call_operand.hbm [shape: f32[64,128], index: 0, kind: input, shape index: {}]   ;;  %s1738_s1 = inlined_call_operand.hbm [shape: f32[128,128], index: 1, kind: input, shape index: {}]   ;;  %s1739_s2 = inlined_call_operand.hbm [shape: f32[128,128], index: 2, kind: input, shape index: {}]   ;;  %s1740_s3 = inlined_call_operand.hbm [shape: f32[128,128], index: 3, kind: input, shape index: {}]   ;;  %s1741_s4 = inlined_call_operand.hbm [shape: f32[128,128], index: 4, kind: input, shape index: {}]   ;;  %s1742_s5 = inlined_call_operand.hbm [shape: f32[128,128], index: 5, kind: input, shape index: {}]   ;;  %s1743_s6 = inlined_call_operand.hbm [shape: f32[128,128], index: 6, kind: input, shape index: {}]   ;;  %s1744_s7 = inlined_call_operand.hbm [shape: f32[6,128], index: 7, kind: input, shape index: {}]   ;;  %s1745_s8 = inlined_call_operand.hbm [shape: f32[64,128], index: 8, kind: output, shape index: {}]  }
   0x1   :  { %1748 = sst [smem:[#allocation23_spill]] %s1738_s1 }
   0x2   :  { %1749 = sst [smem:[#allocation24_spill]] %s1739_s2 }
   0x3   :  { %13 = vsyncpa [#allocation3], 0 }
   0x4   :  { %15 = vsyncpa [#allocation3 + $0x1], 0 }
   0x5   :  { %16 = vsyncpa [#allocation6], 0 }
   0x6   :  { %17 = vsyncpa [#allocation9], 0 }
   0x7   :  { %18 = vsyncpa [#allocation12], 0 }
   0x8   :  { %19 = vsyncpa [#allocation15], 0 }
   0x9   :  { %20 = vsyncpa [#allocation4], 0 }
   0xa   :  { %22 = vsyncpa [#allocation4 + $0x1], 0  ;;  %s1478_s27 = smov 0   ;;  %s1480_s28 = smov 0  }
   0xb   :  { %s1482_s29 = smov 0   ;;  %s1484_s30 = smov 0  }
   0xc LB: > { %s1750_s1 = sld [smem:[#allocation23_spill]]  ;;  %s1502_s12 = sadd.s32 4294967295, %s1420_s30   ;;  %s1420_s30 = sphi %s1484_s30, %s1764_s30   ;;  %s1416_s29 = sphi %s1482_s29, %s1763_s29   ;;  %s1412_s28 = sphi %s1480_s28, %s1762_s28   ;;  %s1408_s27 = sphi %s1478_s27, %s1761_s27  }
   0xd   : > { %p916_p0 = scmp.ge.s32.totalorder %s1420_s30, 1  ;;  %p49_p1 = scmp.eq.s32.totalorder %s1502_s12, 0 }
   0xe   : > { %p232_p2 = scmp.lt.s32.totalorder %s1420_s30, 3  ;;  %s1422_s14 = smov [#allocation5]  }
   0xf   : > { %s245_s15 = sshll.u32 %s1422_s14, 4  ;;  %s271_s18 = sshll.u32 %s1740_s3, 4  ;;  %s246_s15 = int_to_ptr.vmem [resolvable:$true] %s245_s15  ;;  %s272_s18 = int_to_ptr.hbm [resolvable:$true] %s271_s18 }
  0x10   : > { %p1507_p3 = pnand %p916_p0, %p232_p2  ;;  %s299_s22 = sshll.u32 %s1742_s5, 4  ;;  %s300_s22 = int_to_ptr.hbm [resolvable:$true] %s299_s22 }
  0x11   : > { %s1423_s23 = smov [#allocation8]   ;;  %s1746_s25 = smov 128  }
  0x12   : > { %s243_s11 = sshll.u32 %s1750_s1, 4  ;;  %p1009_p4 = pneg %p1507_p3  ;;  %s244_s11 = int_to_ptr.hbm [resolvable:$true] %s243_s11 }
  0x13   : > { %s273_s24 = sshll.u32 %s1423_s23, 4  ;;  %s1747_s26 = smov 8   ;;  %s274_s24 = int_to_ptr.vmem [resolvable:$true] %s273_s24 }
  0x14   : > { %p1519_p6 = pnand %p1009_p4, %p49_p1  ;;  %s1753_s2 = sld [smem:[#allocation24_spill]] }
  0x15   : > { %s1426_s16 = smov [#allocation11]   ;;  %s313_s9 = sshll.u32 %s1743_s6, 4  ;;  %s314_s9 = int_to_ptr.hbm [resolvable:$true] %s313_s9 }
  0x16   : > { %1012 = dma.hbm_to_vmem [thread:$0]  (!%p1519_p6), %s244_s11, 2048, %s246_s15, [#allocation6], %s1746_s25, %s1746_s25, %s1747_s26  }
  0x17   : > { %1018 = dma.hbm_to_vmem [thread:$0]  (!%p1519_p6), %s272_s18, 2048, %s274_s24, [#allocation9], %s1746_s25, %s1746_s25, %s1747_s26  }
  0x18   : > { %s301_s17 = sshll.u32 %s1426_s16, 4  ;;  %s1427_s11 = smov [#allocation7]   ;;  %s302_s17 = int_to_ptr.vmem [resolvable:$true] %s301_s17 }
  0x19   : > { %1024 = dma.hbm_to_vmem [thread:$0]  (!%p1519_p6), %s300_s22, 2048, %s302_s17, [#allocation12], %s1746_s25, %s1746_s25, %s1747_s26  }
  0x1a   : > { %s257_s14 = sshll.u32 %s1753_s2, 4  ;;  %s259_s15 = sshll.u32 %s1427_s11, 4  ;;  %s258_s14 = int_to_ptr.hbm [resolvable:$true] %s257_s14  ;;  %s260_s15 = int_to_ptr.vmem [resolvable:$true] %s259_s15 }
  0x1b   : > { %s285_s18 = sshll.u32 %s1741_s4, 4  ;;  %s1428_s22 = smov [#allocation10]   ;;  %s286_s18 = int_to_ptr.hbm [resolvable:$true] %s285_s18 }
  0x1c   : > { %1015 = dma.hbm_to_vmem [thread:$0]  (!%p1519_p6), %s258_s14, 2048, %s260_s15, [#allocation6], %s1746_s25, %s1746_s25, %s1747_s26  }
  0x1d   : > { %s287_s10 = sshll.u32 %s1428_s22, 4  ;;  %s1429_s14 = smov [#allocation13]   ;;  %s288_s10 = int_to_ptr.vmem [resolvable:$true] %s287_s10 }
  0x1e   : > { %1021 = dma.hbm_to_vmem [thread:$0]  (!%p1519_p6), %s286_s18, 2048, %s288_s10, [#allocation9], %s1746_s25, %s1746_s25, %s1747_s26  }
  0x1f   : > { %s315_s16 = sshll.u32 %s1429_s14, 4  ;;  %s328_s15 = sshll.u32 %s1744_s7, 4  ;;  %s316_s16 = int_to_ptr.vmem [resolvable:$true] %s315_s16  ;;  %s329_s15 = int_to_ptr.hbm [resolvable:$true] %s328_s15 }
  0x20   : > { %1027 = dma.hbm_to_vmem [thread:$0]  (!%p1519_p6), %s314_s9, 2048, %s316_s16, [#allocation12], %s1746_s25, %s1746_s25, %s1747_s26  }
  0x21   : > { %s1430_s20 = smov [#allocation14]   ;;  %s915_s18 = sadd.s32 4294967294, %s1420_s30  }
  0x22   : > { %s330_s21 = sshll.u32 %s1430_s20, 4  ;;  %s1572_s23 = sadd.s32 1, %s1420_s30   ;;  %s331_s21 = int_to_ptr.vmem [resolvable:$true] %s330_s21 }
  0x23   : > { %1030 = dma.hbm_to_vmem [thread:$0]  (!%p1519_p6), %s329_s15, 128, %s331_s21, [#allocation15]  }
  0x24   : > { %s35_s24 = sadd.s32 1, %s1416_s29  ;;  %s32_s22 = ssub.s32 %s1420_s30, %s1572_s23 }
  0x25   : > { %p42_p7 = scmp.ne.s32.totalorder %s1416_s29, %s1412_s28  ;;  %p33_p8 = scmp.eq.s32.totalorder %s32_s22, 0 }
  0x26   : > { %p43_p9 = scmp.eq.s32.totalorder %s1420_s30, 0  ;;  %p48_p10 = scmp.ne.s32.totalorder %s1412_s28, %s1408_s27 }
  0x27   : > { %p219_p11 = scmp.eq.s32.totalorder %s1502_s12, 1  ;;  %p225_p0 = scmp.eq.s32.totalorder %s915_s18, 1 }
  0x28   : > { %s1584_s9 = scalar_select %p33_p8, %s1416_s29, %s35_s24  }
  0x29   : > { %p1588_p12 = por %p49_p1, %p48_p10  ;;  %p1592_p13 = por %p219_p11, %p42_p7 }
  0x2a   : > { %p44_p2 = por %p43_p9, %p42_p7  ;;  %s341_s14 = sand.u32 1, %s1416_s29  }
  0x2b   : > { %p1597_p4 = por %p225_p0, %p48_p10  ;;  %p1046_p6 = scmp.lt.s32.totalorder %s1420_s30, 2 }
  0x2c   : > { %s925_s17 = sshll.u32 %s341_s14, 5  ;;  %s943_s11 = sshll.u32 %s1420_s30, 5 }
  0x2d   : > { %s350_s21 = scalar_lea.hbm %s1737_s0, %s943_s11  ;;  %s345_s22 = scalar_lea.vmem [#allocation2], %s925_s17 }
  0x2e   : > { %s351_s24 = sshll.u32 %s350_s21, 4  ;;  %s353_s25 = sshll.u32 %s345_s22, 4  ;;  %s352_s24 = int_to_ptr.hbm [resolvable:$true] %s351_s24  ;;  %s354_s25 = int_to_ptr.vmem [resolvable:$true] %s353_s25 }
  0x2f   : > { %p1606_p8 = pnand %p1046_p6, %p44_p2  ;;  %s342_s26 = scalar_lea.sflag [#allocation3], %s341_s14 }
  0x30   : > { %s1308_s1 = sshra.s32 %s352_s24, 4  ;;  %s1315_s17 = scalar_lea.hbm %s1737_s0, 64  ;;  %s1309_s1 = int_to_ptr.hbm [resolvable:$true] %s1308_s1 }
  0x31   : > { %s1310_s2 = scalar_lea.hbm %s1309_s1, 32  ;;  %p1312_p9 = pneg %p1606_p8 }
  0x32   : > { %p1311_p7 = scmp.ne.s32.totalorder %s1309_s1, %s1310_s2  ;;  %p1316_p0 = scmp.lt.s32.totalorder %s1309_s1, %s1737_s0 }
  0x33   : > { %p1317_p2 = scmp.lt.s32.totalorder %s1315_s17, %s1310_s2 }
  0x34   : > { %p1313_p10 = pnand %p1312_p9, %p1311_p7 }
  0x35   : > { %p1318_p6 = por %p1317_p2, %p1316_p0 }
  0x36   : > { %p1314_p11 = pneg %p1313_p10 }
  0x38   : > { %p1319_p5 = pnand %p1318_p6, %p1314_p11 }
  0x3a   : > { %1322 = shalt.err (!%p1319_p5)
}
  0x3b   : > { %s1758_s14 = smov 8   ;;  %s1759_s22 = smov 128  }
  0x3c   : > { %1034 = dma.hbm_to_vmem [thread:$0]  (!%p1606_p8), %s352_s24, 512, %s354_s25, %s342_s26, %s1759_s22, %s1759_s22, %s1758_s14  }
  0x3d   : > { %365 = sbr.rel (%p1507_p3) target bundleno = 943 (0x3af), region = 52  ;;  %s1626_s11 = sand.u32 (!%p1507_p3), 1, %s1412_s28  }
  0x3e   : > { %s929_s1 = sshll.u32 (!%p1507_p3), %s1626_s11, 5  ;;  %s368_s2 = scalar_lea.sflag (!%p1507_p3), [#allocation3], %s1626_s11 }
  0x3f   : > { %s1632_s15 = scalar_lea.vmem (!%p1507_p3), [#allocation2], %s929_s1 }
  0x42   : > { %1383 = dma.done.wait (%p1588_p12), %s368_s2, 512  }
  0x43   : > { %1385 = vsyncadd (%p1588_p12), %s368_s2, 4294966784 }
  0x44   : > { %1387 = dma.done.wait (%p49_p1), [#allocation6], 4096  }
  0x45   : > { %1389 = vsyncadd (%p49_p1), [#allocation6], 4294963200 }
  0x46   : > { %1391 = dma.done.wait (%p49_p1), [#allocation9], 4096  }
  0x47   : > { %1393 = vsyncadd (%p49_p1), [#allocation9], 4294963200 }
  0x48   : > { %1395 = dma.done.wait (%p49_p1), [#allocation12], 4096  }
  0x49   : > { %1397 = vsyncadd (%p49_p1), [#allocation12], 4294963200 }
  0x4a   : > { %1399 = dma.done.wait (%p49_p1), [#allocation15], 128  }
  0x4b   : > { %1401 = vsyncadd (%p49_p1), [#allocation15], 4294967168  ;;  %v462_v0 = vld [vmem:[#allocation5 + $0x78] sm:$0xff]  ;;  %v461_v1 = vld [vmem:[#allocation5 + $0x70] sm:$0xff]  ;;  %s439_s13 = scalar_lea.vmem [#allocation16], %s929_s1  ;;  %s944_s25 = sshll.u32 %s1502_s12, 5 }
  0x4c   : > { %464 = vmatpush.msra.mxu0 %v462_v0  ;;  %v460_v2 = vld [vmem:[#allocation5 + $0x68] sm:$0xff]  ;;  %v459_v3 = vld [vmem:[#allocation5 + $0x60] sm:$0xff]  ;;  %v458_v4 = vld [vmem:[#allocation5 + $0x58] sm:$0xff]  ;;  %s771_s24 = scalar_lea.hbm %s1745_s8, %s944_s25  ;;  %s772_s18 = sshll.u32 %s439_s13, 4  ;;  %s773_s18 = int_to_ptr.vmem [resolvable:$true] %s772_s18 }
  0x4d   : > { %v457_v5 = vld [vmem:[#allocation5 + $0x50] sm:$0xff]  ;;  %v456_v6 = vld [vmem:[#allocation5 + $0x48] sm:$0xff]  ;;  %v455_v7 = vld [vmem:[#allocation5 + $0x40] sm:$0xff]  ;;  %s774_s17 = sshll.u32 %s771_s24, 4  ;;  %s760_s20 = scalar_lea.sflag [#allocation4], %s1626_s11  ;;  %s775_s17 = int_to_ptr.hbm [resolvable:$true] %s774_s17 }
  0x4e   : > { %465 = vmatpush.msra.mxu0 %v461_v1  ;;  %v454_v8 = vld [vmem:[#allocation5 + $0x38] sm:$0xff]  ;;  %v453_v9 = vld [vmem:[#allocation5 + $0x30] sm:$0xff]  ;;  %v452_v10 = vld [vmem:[#allocation5 + $0x28] sm:$0xff]  ;;  %s1352_s21 = sshra.s32 %s775_s17, 4  ;;  %s1358_s1 = scalar_lea.hbm %s1745_s8, 64  ;;  %s1353_s21 = int_to_ptr.hbm [resolvable:$true] %s1352_s21 }
  0x4f   : > { %v451_v11 = vld [vmem:[#allocation5 + $0x20] sm:$0xff]  ;;  %v450_v12 = vld [vmem:[#allocation5 + $0x18] sm:$0xff]  ;;  %v449_v13 = vld [vmem:[#allocation5 + $0x10] sm:$0xff]  ;;  %s1354_s12 = scalar_lea.hbm %s1353_s21, 32  ;;  %p1359_p12 = scmp.lt.s32.totalorder %s1353_s21, %s1745_s8 }
  0x50   : > { %466 = vmatpush.msra.mxu0 %v460_v2  ;;  %v512_v14 = vld [vmem:[#allocation7 + $0x78] sm:$0xff]  ;;  %v511_v15 = vld [vmem:[#allocation7 + $0x70] sm:$0xff]  ;;  %v448_v16 = vld [vmem:[#allocation5 + $0x8] sm:$0xff]  ;;  %p1355_p1 = scmp.ne.s32.totalorder %s1353_s21, %s1354_s12  ;;  %p1360_p8 = scmp.lt.s32.totalorder %s1358_s1, %s1354_s12 }
  0x51   : > { %514 = vmatpush.msra.mxu1 %v512_v14  ;;  %v510_v17 = vld [vmem:[#allocation7 + $0x68] sm:$0xff]  ;;  %v447_v18 = vld [vmem:[#allocation5] sm:$0xff]  ;;  %v508_v21 = vld [vmem:[#allocation7 + $0x58] sm:$0xff] }
  0x52   : > { %467 = vmatpush.msra.mxu0 %v459_v3  ;;  %v509_v19 = vld [vmem:[#allocation7 + $0x60] sm:$0xff]  ;;  %v507_v22 = vld [vmem:[#allocation7 + $0x50] sm:$0xff]  ;;  %v506_v23 = vld [vmem:[#allocation7 + $0x48] sm:$0xff]  ;;  %p1356_p3 = pnand %p1355_p1, %p1592_p13  ;;  %p1361_p7 = por %p1360_p8, %p1359_p12 }
  0x53   : > { %515 = vmatpush.msra.mxu1 %v511_v15  ;;  %v443_v20 = vld [vmem:[%s1632_s15] sm:$0xff]  ;;  %v444_v25 = vld [vmem:[%s1632_s15 + $0x8] sm:$0xff]  ;;  %v504_v26 = vld [vmem:[#allocation7 + $0x38] sm:$0xff] }
  0x54   : > { %468 = vmatpush.msra.mxu0 %v458_v4  ;;  %v505_v24 = vld [vmem:[#allocation7 + $0x40] sm:$0xff]  ;;  %v503_v27 = vld [vmem:[#allocation7 + $0x30] sm:$0xff]  ;;  %v502_v28 = vld [vmem:[#allocation7 + $0x28] sm:$0xff]  ;;  %p1357_p5 = pneg %p1356_p3 }
  0x55   : > { %516 = vmatpush.msra.mxu1 %v510_v17  ;;  %v501_v29 = vld [vmem:[#allocation7 + $0x20] sm:$0xff]  ;;  %v445_v30 = vld [vmem:[%s1632_s15 + $0x10] sm:$0xff]  ;;  %v500_v31 = vld [vmem:[#allocation7 + $0x18] sm:$0xff] }
  0x56   : > { %469 = vmatpush.msra.mxu0 %v457_v5  ;;  %v446_v32 = vld [vmem:[%s1632_s15 + $0x18] sm:$0xff]  ;;  %v499_v33 = vld [vmem:[#allocation7 + $0x10] sm:$0xff]  ;;  %v498_v34 = vld [vmem:[#allocation7 + $0x8] sm:$0xff]  ;;  %p1362_p9 = pnand %p1361_p7, %p1357_p5 }
  0x57   : > { %517 = vmatpush.msra.mxu1 %v509_v19  ;;  %v497_v35 = vld [vmem:[#allocation7] sm:$0xff]  ;;  %v562_v38 = vld [vmem:[#allocation8 + $0x78] sm:$0xff]  ;;  %v561_v39 = vld [vmem:[#allocation8 + $0x70] sm:$0xff] }
  0x58   : > { %470 = vmatpush.msra.mxu0 %v456_v6  ;;  %v1658_v36 = vld [vmem:[#allocation14] sm:$0x3f]  ;;  %564 = vmatpush.msra.mxu2 %v562_v38  ;;  %v560_v40 = vld [vmem:[#allocation8 + $0x68] sm:$0xff]  ;;  %v558_v45 = vld [vmem:[#allocation8 + $0x58] sm:$0xff] }
  0x59   : > { %518 = vmatpush.msra.mxu1 %v508_v21  ;;  %v463_v37 = vperm.slane %v1658_v36, 0  ;;  %v559_v43 = vld [vmem:[#allocation8 + $0x60] sm:$0xff]  ;;  %v557_v46 = vld [vmem:[#allocation8 + $0x50] sm:$0xff]  ;;  %v556_v47 = vld [vmem:[#allocation8 + $0x48] sm:$0xff]  ;;  %v513_v2 = vperm.slane %v1658_v36, 1 }
  0x5a   : > { %471 = vmatpush.msra.mxu0 %v455_v7  ;;  %565 = vmatpush.msra.mxu2 %v561_v39  ;;  %v555_v50 = vld [vmem:[#allocation8 + $0x40] sm:$0xff]  ;;  %v554_v52 = vld [vmem:[#allocation8 + $0x38] sm:$0xff]  ;;  %v553_v53 = vld [vmem:[#allocation8 + $0x30] sm:$0xff] }
  0x5b   : > { %519 = vmatpush.msra.mxu1 %v507_v22  ;;  %v552_v54 = vld [vmem:[#allocation8 + $0x28] sm:$0xff]  ;;  %v551_v57 = vld [vmem:[#allocation8 + $0x20] sm:$0xff]  ;;  %v550_v59 = vld [vmem:[#allocation8 + $0x18] sm:$0xff] }
  0x5c   : > { %472 = vmatpush.msra.mxu0 %v454_v8  ;;  %566 = vmatpush.msra.mxu2 %v560_v40  ;;  %v549_v63 = vld [vmem:[#allocation8 + $0x10] sm:$0xff]  ;;  %v548_v0 = vld [vmem:[#allocation8 + $0x8] sm:$0xff]  ;;  %v547_v1 = vld [vmem:[#allocation8] sm:$0xff] }
  0x5d   : > { %520 = vmatpush.msra.mxu1 %v506_v23  ;;  %v612_v3 = vld [vmem:[#allocation10 + $0x78] sm:$0xff]  ;;  %v611_v4 = vld [vmem:[#allocation10 + $0x70] sm:$0xff]  ;;  %v610_v5 = vld [vmem:[#allocation10 + $0x68] sm:$0xff] }
  0x5e   : > { %473 = vmatpush.msra.mxu0 %v453_v9  ;;  %567 = vmatpush.msra.mxu2 %v559_v43  ;;  %v609_v8 = vld [vmem:[#allocation10 + $0x60] sm:$0xff]  ;;  %v604_v17 = vld [vmem:[#allocation10 + $0x38] sm:$0xff]  ;;  %v602_v19 = vld [vmem:[#allocation10 + $0x28] sm:$0xff] }
  0x5f   : > { %521 = vmatpush.msra.mxu1 %v505_v24  ;;  %614 = vmatpush.msra.mxu3 %v612_v3  ;;  %v605_v15 = vld [vmem:[#allocation10 + $0x40] sm:$0xff]  ;;  %v600_v24 = vld [vmem:[#allocation10 + $0x18] sm:$0xff] }
  0x60   : > { %474 = vmatpush.msra.mxu0 %v452_v10  ;;  %568 = vmatpush.msra.mxu2 %v558_v45  ;;  %v608_v10 = vld [vmem:[#allocation10 + $0x58] sm:$0xff]  ;;  %v601_v22 = vld [vmem:[#allocation10 + $0x20] sm:$0xff] }
  0x61   : > { %522 = vmatpush.msra.mxu1 %v504_v26  ;;  %615 = vmatpush.msra.mxu3 %v611_v4  ;;  %v663_v38 = vld [vmem:[#allocation11 + $0x60] sm:$0xff]  ;;  %v662_v40 = vld [vmem:[#allocation11 + $0x58] sm:$0xff] }
  0x62   : > { %475 = vmatpush.msra.mxu0 %v451_v11  ;;  %569 = vmatpush.msra.mxu2 %v557_v46  ;;  %v607_v11 = vld [vmem:[#allocation10 + $0x50] sm:$0xff]  ;;  %v659_v45 = vld [vmem:[#allocation11 + $0x40] sm:$0xff] }
  0x63   : > { %523 = vmatpush.msra.mxu1 %v503_v27  ;;  %616 = vmatpush.msra.mxu3 %v610_v5  ;;  %v713_v4 = vld [vmem:[#allocation13 + $0x60] sm:$0xff] }
  0x64   : > { %476 = vmatpush.msra.mxu0 %v450_v12  ;;  %570 = vmatpush.msra.mxu2 %v556_v47  ;;  %v606_v12 = vld [vmem:[#allocation10 + $0x48] sm:$0xff]  ;;  %v658_v47 = vld [vmem:[#allocation11 + $0x38] sm:$0xff] }
  0x65   : > { %524 = vmatpush.msra.mxu1 %v502_v28  ;;  %617 = vmatpush.msra.mxu3 %v609_v8  ;;  %v599_v28 = vld [vmem:[#allocation10 + $0x10] sm:$0xff] }
  0x66   : > { %477 = vmatpush.msra.mxu0 %v449_v13  ;;  %571 = vmatpush.msra.mxu2 %v555_v50  ;;  %v711_v8 = vld [vmem:[#allocation13 + $0x50] sm:$0xff] }
  0x67   : > { %525 = vmatpush.msra.mxu1 %v501_v29  ;;  %618 = vmatpush.msra.mxu3 %v608_v10  ;;  %v598_v29 = vld [vmem:[#allocation10 + $0x8] sm:$0xff] }
  0x68   : > { %478 = vmatpush.msra.mxu0 %v448_v16  ;;  %572 = vmatpush.msra.mxu2 %v554_v52  ;;  %v655_v52 = vld [vmem:[#allocation11 + $0x20] sm:$0xff] }
  0x69   : > { %526 = vmatpush.msra.mxu1 %v500_v31  ;;  %619 = vmatpush.msra.mxu3 %v607_v11  ;;  %v563_v31 = vperm.slane %v1658_v36, 2 }
  0x6a   : > { %479 = vmatpush.msra.mxu0 %v447_v18  ;;  %573 = vmatpush.msra.mxu2 %v553_v53  ;;  %v603_v18 = vld [vmem:[#allocation10 + $0x30] sm:$0xff] }
  0x6b   : > { %480 = vmatmul.f32.vlgmr.msra.gmra.mxu0 %v443_v20  ;;  %527 = vmatpush.msra.mxu1 %v499_v33  ;;  %v665_v33 = vld [vmem:[#allocation11 + $0x70] sm:$0xff] }
  0x6c   : > { %574 = vmatpush.msra.mxu2 %v552_v54  ;;  %620 = vmatpush.msra.mxu3 %v606_v12  ;;  %v710_v12 = vld [vmem:[#allocation13 + $0x48] sm:$0xff] }
  0x6d   : > { %528 = vmatpush.msra.mxu1 %v498_v34  ;;  %v664_v34 = vld [vmem:[#allocation11 + $0x68] sm:$0xff] }
  0x6e   : > { %575 = vmatpush.msra.mxu2 %v551_v57  ;;  %621 = vmatpush.msra.mxu3 %v605_v15  ;;  %v654_v57 = vld [vmem:[#allocation11 + $0x18] sm:$0xff]  ;;  %v709_v15 = vld [vmem:[#allocation13 + $0x40] sm:$0xff] }
  0x6f   : > { %529 = vmatpush.msra.mxu1 %v497_v35 }
  0x70   : > { %576 = vmatpush.msra.mxu2 %v550_v59  ;;  %622 = vmatpush.msra.mxu3 %v604_v17  ;;  %v652_v59 = vld [vmem:[#allocation11 + $0x8] sm:$0xff]  ;;  %v707_v17 = vld [vmem:[#allocation13 + $0x30] sm:$0xff] }
  0x72   : > { %577 = vmatpush.msra.mxu2 %v549_v63  ;;  %623 = vmatpush.msra.mxu3 %v603_v18  ;;  %v715_v63 = vld [vmem:[#allocation13 + $0x70] sm:$0xff] }
  0x73   : > { %483 = vmatmul.f32.gmra.mxu0 %v444_v25 }
  0x74   : > { %578 = vmatpush.msra.mxu2 %v548_v0  ;;  %624 = vmatpush.msra.mxu3 %v602_v19 }
  0x76   : > { %579 = vmatpush.msra.mxu2 %v547_v1  ;;  %625 = vmatpush.msra.mxu3 %v601_v22 }
  0x78   : > { %626 = vmatpush.msra.mxu3 %v600_v24  ;;  %v705_v24 = vld [vmem:[#allocation13 + $0x20] sm:$0xff] }
  0x7a   : > { %627 = vmatpush.msra.mxu3 %v599_v28 }
  0x7b   : > { %486 = vmatmul.f32.gmra.mxu0 %v445_v30  ;;  %v597_v30 = vld [vmem:[#allocation10] sm:$0xff] }
  0x7c   : > { %628 = vmatpush.msra.mxu3 %v598_v29 }
  0x7e   : > { %629 = vmatpush.msra.mxu3 %v597_v30 }
  0x83   : > { %489 = vmatmul.f32.gmra.mxu0 %v446_v32  ;;  %v666_v32 = vld [vmem:[#allocation11 + $0x78] sm:$0xff] }
  0x84   : > { %668 = vmatpush.msrb.mxu0 %v666_v32  ;;  %945 = vmatpush.msrb.mxu2 %v666_v32  ;;  %v702_v32 = vld [vmem:[#allocation13 + $0x8] sm:$0xff] }
  0x86   : > { %669 = vmatpush.msrb.mxu0 %v665_v33  ;;  %946 = vmatpush.msrb.mxu2 %v665_v33 }
  0x88   : > { %670 = vmatpush.msrb.mxu0 %v664_v34  ;;  %947 = vmatpush.msrb.mxu2 %v664_v34 }
  0x8a   : > { %671 = vmatpush.msrb.mxu0 %v663_v38  ;;  %948 = vmatpush.msrb.mxu2 %v663_v38 }
  0x8c   : > { %672 = vmatpush.msrb.mxu0 %v662_v40  ;;  %949 = vmatpush.msrb.mxu2 %v662_v40 }
  0xe8   : > { %v481_v41 = vpop.f32.mrf.mxu0 }
  0xe9   : > { %v482_v42 = vadd.f32 %v481_v41, %v463_v37  ;;  %v661_v41 = vld [vmem:[#allocation11 + $0x50] sm:$0xff] }
  0xea   : > { %673 = vmatpush.msrb.mxu0 %v661_v41  ;;  %950 = vmatpush.msrb.mxu2 %v661_v41 }
  0xeb   : > { %v493_v44 = vmax.f32 %v482_v42, 0.0  ;;  %v660_v42 = vld [vmem:[#allocation11 + $0x48] sm:$0xff] }
  0xec   : > { %674 = vmatpush.msrb.mxu0 %v660_v42  ;;  %951 = vmatpush.msrb.mxu2 %v660_v42 }
  0xed   : > { %530 = vmatmul.f32.vlgmr.msra.gmra.mxu1 %v493_v44 }
  0xee   : > { %675 = vmatpush.msrb.mxu0 %v659_v45  ;;  %952 = vmatpush.msrb.mxu2 %v659_v45 }
  0xf0   : > { %v484_v48 = vpop.f32.mrf.mxu0  ;;  %676 = vmatpush.msrb.mxu0 %v658_v47  ;;  %953 = vmatpush.msrb.mxu2 %v658_v47 }
  0xf1   : > { %v485_v49 = vadd.f32 %v484_v48, %v463_v37  ;;  %v657_v48 = vld [vmem:[#allocation11 + $0x30] sm:$0xff] }
  0xf2   : > { %677 = vmatpush.msrb.mxu0 %v657_v48  ;;  %954 = vmatpush.msrb.mxu2 %v657_v48 }
  0xf3   : > { %v494_v51 = vmax.f32 %v485_v49, 0.0  ;;  %v656_v49 = vld [vmem:[#allocation11 + $0x28] sm:$0xff] }
  0xf4   : > { %678 = vmatpush.msrb.mxu0 %v656_v49  ;;  %955 = vmatpush.msrb.mxu2 %v656_v49 }
  0xf5   : > { %533 = vmatmul.f32.gmra.mxu1 %v494_v51 }
  0xf6   : > { %679 = vmatpush.msrb.mxu0 %v655_v52  ;;  %956 = vmatpush.msrb.mxu2 %v655_v52 }
  0xf8   : > { %v487_v55 = vpop.f32.mrf.mxu0  ;;  %680 = vmatpush.msrb.mxu0 %v654_v57  ;;  %957 = vmatpush.msrb.mxu2 %v654_v57 }
  0xf9   : > { %v488_v56 = vadd.f32 %v487_v55, %v463_v37 }
  0xfb   : > { %v495_v58 = vmax.f32 %v488_v56, 0.0 }
  0xfd   : > { %536 = vmatmul.f32.gmra.mxu1 %v495_v58  ;;  %v653_v58 = vld [vmem:[#allocation11 + $0x10] sm:$0xff] }
  0xfe   : > { %681 = vmatpush.msrb.mxu0 %v653_v58  ;;  %958 = vmatpush.msrb.mxu2 %v653_v58 }
 0x100   : > { %v490_v60 = vpop.f32.mrf.mxu0  ;;  %682 = vmatpush.msrb.mxu0 %v652_v59  ;;  %959 = vmatpush.msrb.mxu2 %v652_v59 }
 0x101   : > { %v491_v61 = vadd.f32 %v490_v60, %v463_v37  ;;  %v651_v60 = vld [vmem:[#allocation11] sm:$0xff] }
 0x102   : > { %683 = vmatpush.msrb.mxu0 %v651_v60  ;;  %960 = vmatpush.msrb.mxu2 %v651_v60 }
 0x103   : > { %v496_v62 = vmax.f32 %v491_v61, 0.0  ;;  %v613_v61 = vperm.slane %v1658_v36, 3 }
 0x105   : > { %539 = vmatmul.f32.gmra.mxu1 %v496_v62  ;;  %v716_v62 = vld [vmem:[#allocation13 + $0x78] sm:$0xff] }
 0x106   : > { %718 = vmatpush.msrb.mxu1 %v716_v62  ;;  %961 = vmatpush.msrb.mxu3 %v716_v62 }
 0x108   : > { %719 = vmatpush.msrb.mxu1 %v715_v63  ;;  %962 = vmatpush.msrb.mxu3 %v715_v63 }
 0x16a   : > { %v531_v6 = vpop.f32.mrf.mxu1 }
 0x16b   : > { %v1662_v7 = vadd.f32 %v531_v6, %v513_v2  ;;  %v712_v6 = vld [vmem:[#allocation13 + $0x58] sm:$0xff] }
 0x16d   : > { %v543_v9 = vmax.f32 %v1662_v7, 0.0 }
 0x16f   : > { %580 = vmatmul.f32.vlgmr.msra.gmra.mxu2 %v543_v9 }
 0x172   : > { %v534_v13 = vpop.f32.mrf.mxu1 }
 0x173   : > { %v1667_v14 = vadd.f32 %v534_v13, %v513_v2 }
 0x175   : > { %v544_v16 = vmax.f32 %v1667_v14, 0.0 }
 0x177   : > { %583 = vmatmul.f32.gmra.mxu2 %v544_v16 }
 0x17a   : > { %v537_v20 = vpop.f32.mrf.mxu1 }
 0x17b   : > { %v1672_v21 = vadd.f32 %v537_v20, %v513_v2  ;;  %v706_v20 = vld [vmem:[#allocation13 + $0x28] sm:$0xff] }
 0x17d   : > { %v545_v23 = vmax.f32 %v1672_v21, 0.0  ;;  %v701_v21 = vld [vmem:[#allocation13] sm:$0xff] }
 0x17f   : > { %586 = vmatmul.f32.gmra.mxu2 %v545_v23 }
 0x182   : > { %v540_v25 = vpop.f32.mrf.mxu1 }
 0x183   : > { %v1677_v26 = vadd.f32 %v540_v25, %v513_v2  ;;  %v714_v2 = vld [vmem:[#allocation13 + $0x68] sm:$0xff] }
 0x184   : > { %720 = vmatpush.msrb.mxu1 %v714_v2  ;;  %963 = vmatpush.msrb.mxu3 %v714_v2 }
 0x185   : > { %v546_v27 = vmax.f32 %v1677_v26, 0.0 }
 0x186   : > { %721 = vmatpush.msrb.mxu1 %v713_v4  ;;  %964 = vmatpush.msrb.mxu3 %v713_v4 }
 0x187   : > { %589 = vmatmul.f32.gmra.mxu2 %v546_v27 }
 0x188   : > { %722 = vmatpush.msrb.mxu1 %v712_v6  ;;  %965 = vmatpush.msrb.mxu3 %v712_v6 }
 0x18a   : > { %723 = vmatpush.msrb.mxu1 %v711_v8  ;;  %966 = vmatpush.msrb.mxu3 %v711_v8 }
 0x18c   : > { %724 = vmatpush.msrb.mxu1 %v710_v12  ;;  %967 = vmatpush.msrb.mxu3 %v710_v12 }
 0x18e   : > { %725 = vmatpush.msrb.mxu1 %v709_v15  ;;  %968 = vmatpush.msrb.mxu3 %v709_v15 }
 0x1f2   : > { %v581_v35 = vpop.f32.mrf.mxu2 }
 0x1f3   : > { %v582_v37 = vadd.f32 %v581_v35, %v563_v31 }
 0x1f5   : > { %v593_v39 = vmax.f32 %v582_v37, 0.0 }
 0x1f7   : > { %630 = vmatmul.f32.vlgmr.msra.gmra.mxu3 %v593_v39 }
 0x1fa   : > { %v584_v43 = vpop.f32.mrf.mxu2 }
 0x1fb   : > { %v585_v44 = vadd.f32 %v584_v43, %v563_v31 }
 0x1fd   : > { %v594_v46 = vmax.f32 %v585_v44, 0.0  ;;  %v717_v44 = vperm.slane %v1658_v36, 5 }
 0x1ff   : > { %633 = vmatmul.f32.gmra.mxu3 %v594_v46 }
 0x202   : > { %v587_v50 = vpop.f32.mrf.mxu2 }
 0x203   : > { %v588_v51 = vadd.f32 %v587_v50, %v563_v31 }
 0x205   : > { %v595_v53 = vmax.f32 %v588_v51, 0.0 }
 0x207   : > { %636 = vmatmul.f32.gmra.mxu3 %v595_v53 }
 0x20a   : > { %v590_v54 = vpop.f32.mrf.mxu2 }
 0x20b   : > { %v591_v55 = vadd.f32 %v590_v54, %v563_v31  ;;  %v703_v31 = vld [vmem:[#allocation13 + $0x10] sm:$0xff] }
 0x20d   : > { %v596_v56 = vmax.f32 %v591_v55, 0.0 }
 0x20f   : > { %639 = vmatmul.f32.gmra.mxu3 %v596_v56 }
 0x27a   : > { %v631_v0 = vpop.f32.mrf.mxu3 }
 0x27b   : > { %v632_v1 = vadd.f32 %v631_v0, %v613_v61 }
 0x27d   : > { %v643_v3 = vmax.f32 %v632_v1, 0.0 }
 0x27f   : > { %v1686_v5 = vadd.f32 %v643_v3, %v543_v9  ;;  %v708_v9 = vld [vmem:[#allocation13 + $0x38] sm:$0xff] }
 0x280   : > { %726 = vmatpush.msrb.mxu1 %v708_v9  ;;  %969 = vmatpush.msrb.mxu3 %v708_v9 }
 0x281   : > { %684 = vmatmul.f32.vlgmr.msrb.gmra.mxu0 %v1686_v5 }
 0x282   : > { %v634_v10 = vpop.f32.mrf.mxu3  ;;  %727 = vmatpush.msrb.mxu1 %v707_v17  ;;  %970 = vmatpush.msrb.mxu3 %v707_v17 }
 0x283   : > { %v635_v11 = vadd.f32 %v634_v10, %v613_v61 }
 0x284   : > { %728 = vmatpush.msrb.mxu1 %v706_v20  ;;  %971 = vmatpush.msrb.mxu3 %v706_v20 }
 0x285   : > { %v644_v13 = vmax.f32 %v635_v11, 0.0 }
 0x286   : > { %729 = vmatpush.msrb.mxu1 %v705_v24  ;;  %972 = vmatpush.msrb.mxu3 %v705_v24 }
 0x287   : > { %v1691_v7 = vadd.f32 %v644_v13, %v544_v16  ;;  %v704_v16 = vld [vmem:[#allocation13 + $0x18] sm:$0xff] }
 0x288   : > { %730 = vmatpush.msrb.mxu1 %v704_v16  ;;  %973 = vmatpush.msrb.mxu3 %v704_v16 }
 0x289   : > { %687 = vmatmul.f32.gmra.mxu0 %v1691_v7 }
 0x28a   : > { %v637_v18 = vpop.f32.mrf.mxu3  ;;  %731 = vmatpush.msrb.mxu1 %v703_v31  ;;  %974 = vmatpush.msrb.mxu3 %v703_v31 }
 0x28b   : > { %v638_v19 = vadd.f32 %v637_v18, %v613_v61 }
 0x28c   : > { %732 = vmatpush.msrb.mxu1 %v702_v32  ;;  %975 = vmatpush.msrb.mxu3 %v702_v32 }
 0x28d   : > { %v645_v22 = vmax.f32 %v638_v19, 0.0 }
 0x28e   : > { %733 = vmatpush.msrb.mxu1 %v701_v21  ;;  %976 = vmatpush.msrb.mxu3 %v701_v21 }
 0x28f   : > { %v649_v14 = vadd.f32 %v645_v22, %v545_v23  ;;  %v667_v23 = vperm.slane %v1658_v36, 4 }
 0x291   : > { %690 = vmatmul.f32.vlgmr.msrb.gmra.mxu2 %v649_v14 }
 0x292   : > { %v640_v25 = vpop.f32.mrf.mxu3 }
 0x293   : > { %v641_v28 = vadd.f32 %v640_v25, %v613_v61 }
 0x295   : > { %v646_v29 = vmax.f32 %v641_v28, 0.0 }
 0x297   : > { %v650_v30 = vadd.f32 %v646_v29, %v546_v27 }
 0x299   : > { %693 = vmatmul.f32.gmra.mxu2 %v650_v30 }
 0x2fe   : > { %v685_v33 = vpop.f32.mrf.mxu0 }
 0x2ff   : > { %v686_v34 = vadd.f32 %v685_v33, %v667_v23 }
 0x301   : > { %v697_v35 = vmax.f32 %v686_v34, 0.0 }
 0x303   : > { %734 = vmatmul.f32.vlgmr.msrb.gmra.mxu1 %v697_v35 }
 0x306   : > { %v688_v37 = vpop.f32.mrf.mxu0 }
 0x307   : > { %v689_v38 = vadd.f32 %v688_v37, %v667_v23 }
 0x309   : > { %v698_v26 = vmax.f32 %v689_v38, 0.0 }
 0x30b   : > { %737 = vmatmul.f32.gmra.mxu1 %v698_v26 }
 0x314   : > { %v691_v27 = vpop.f32.mrf.mxu2 }
 0x315   : > { %v692_v39 = vadd.f32 %v691_v27, %v667_v23 }
 0x317   : > { %v699_v40 = vmax.f32 %v692_v39, 0.0 }
 0x319   : > { %740 = vmatmul.f32.vlgmr.msrb.gmra.mxu3 %v699_v40 }
 0x31c   : > { %v694_v41 = vpop.f32.mrf.mxu2 }
 0x31d   : > { %v695_v42 = vadd.f32 %v694_v41, %v667_v23 }
 0x31f   : > { %v700_v43 = vmax.f32 %v695_v42, 0.0 }
 0x321   : > { %743 = vmatmul.f32.gmra.mxu3 %v700_v43 }
 0x380   : > { %v735_v45 = vpop.f32.mrf.mxu1 }
 0x381   : > { %v736_v46 = vadd.f32 %v735_v45, %v717_v44 }
 0x383   : > { %v747_v47 = vmax.f32 %v736_v46, 0.0 }
 0x385   : > { %v751_v48 = vadd.f32 %v747_v47, %v1686_v5 }
 0x387   : > { %755 = vst [vmem:[%s439_s13] sm:$0xff] %v751_v48 }
 0x388   : > { %v738_v49 = vpop.f32.mrf.mxu1 }
 0x389   : > { %v739_v50 = vadd.f32 %v738_v49, %v717_v44 }
 0x38b   : > { %v748_v51 = vmax.f32 %v739_v50, 0.0 }
 0x38d   : > { %v752_v52 = vadd.f32 %v748_v51, %v1691_v7 }
 0x38f   : > { %756 = vst [vmem:[%s439_s13 + $0x8] sm:$0xff] %v752_v52 }
 0x39c   : > { %v741_v53 = vpop.f32.mrf.mxu3 }
 0x39d   : > { %v742_v54 = vadd.f32 %v741_v53, %v717_v44 }
 0x39f   : > { %v749_v55 = vmax.f32 %v742_v54, 0.0 }
 0x3a1   : > { %v753_v36 = vadd.f32 %v749_v55, %v649_v14 }
 0x3a3   : > { %757 = vst [vmem:[%s439_s13 + $0x10] sm:$0xff] %v753_v36 }
 0x3a4   : > { %v744_v56 = vpop.f32.mrf.mxu3 }
 0x3a5   : > { %v745_v57 = vadd.f32 %v744_v56, %v717_v44 }
 0x3a7   : > { %v750_v58 = vmax.f32 %v745_v57, 0.0 }
 0x3a9   : > { %v754_v59 = vadd.f32 %v750_v58, %v650_v30 }
 0x3ab   : > { %758 = vst [vmem:[%s439_s13 + $0x18] sm:$0xff] %v754_v59 }
 0x3ac   : > { %1365 = shalt.err (!%p1362_p9)
}
 0x3ad   : > { %s1431_s11 = smov 128   ;;  %s1432_s13 = smov 8  }
 0x3ae   : > { %1007 = dma.vmem_to_hbm [thread:$0]  (%p1592_p13), %s773_s18, 512, %s775_s17, %s760_s20, %s1431_s11, %s1431_s11, %s1432_s13  }
 0x3af PF: > { %s789_s25 = sand.u32 1, %s1408_s27   ;;  %p1760_p10 = scmp.ge.s32.totalorder %s1420_s30, 2 }
 0x3b0   : > { %s790_s26 = scalar_lea.sflag [#allocation4], %s789_s25 }
 0x3b1   : > { %p1036_p11 = pnand %p1760_p10, %p1597_p4 }
 0x3b3   : > { %p1037_p0 = pneg %p1036_p11 }
 0x3b5   : > { %1403 = dma.done.wait (%p1037_p0), %s790_s26, 512  }
 0x3b6   : > { %1405 = vsyncadd (%p1037_p0), %s790_s26, 4294966784  ;;  %p25_p2 = scmp.ge.s32.totalorder %s1572_s23, 4   ;;  %s1761_s27 = smov %s1412_s28 }
 0x3b7   : > { %s1762_s28 = smov %s1416_s29  ;;  %s1763_s29 = smov %s1584_s9 }
 0x3b8   : > { %s1764_s30 = smov %s1572_s23  ;;  %27 = sbr.rel (!%p25_p2) target bundleno = 12 (0xc), region = 125 }
 0x3bd   :  { %796 = vsyncpa [#allocation3], 1 }
 0x3be   :  { %798 = vsyncpa [#allocation3 + $0x1], 1 }
 0x3bf   :  { %799 = vsyncpa [#allocation6], 1 }
 0x3c0   :  { %800 = vsyncpa [#allocation9], 1 }
 0x3c1   :  { %801 = vsyncpa [#allocation12], 1 }
 0x3c2   :  { %802 = vsyncpa [#allocation15], 1 }
 0x3c3   :  { %803 = vsyncpa [#allocation4], 1 }
 0x3c4   :  { %805 = vsyncpa [#allocation4 + $0x1], 1 }

// kernel: tpu_custom_call.1
= control target key start
LH: loop header
LB: loop body
LE: loop exit
PB: predicated region body
PF: predicated region fallthrough
CT: control target
= control target key end

     0   :  { %s1737_s0 = inlined_call_operand.hbm [shape: f32[64,128], index: 0, kind: input, shape index: {}]   ;;  %s1738_s1 = inlined_call_operand.hbm [shape: f32[128,128], index: 1, kind: input, shape index: {}]   ;;  %s1739_s2 = inlined_call_operand.hbm [shape: f32[128,128], index: 2, kind: input, shape index: {}]   ;;  %s1740_s3 = inlined_call_operand.hbm [shape: f32[128,128], index: 3, kind: input, shape index: {}]   ;;  %s1741_s4 = inlined_call_operand.hbm [shape: f32[128,128], index: 4, kind: input, shape index: {}]   ;;  %s1742_s5 = inlined_call_operand.hbm [shape: f32[128,128], index: 5, kind: input, shape index: {}]   ;;  %s1743_s6 = inlined_call_operand.hbm [shape: f32[128,128], index: 6, kind: input, shape index: {}]   ;;  %s1744_s7 = inlined_call_operand.hbm [shape: f32[6,128], index: 7, kind: input, shape index: {}]   ;;  %s1745_s8 = inlined_call_operand.hbm [shape: f32[64,128], index: 8, kind: output, shape index: {}]  }
   0x1   :  { %1748 = sst [smem:[#allocation23_spill]] %s1738_s1 }
   0x2   :  { %1749 = sst [smem:[#allocation24_spill]] %s1739_s2 }
   0x3   :  { %13 = vsyncpa [#allocation3], 0 }
   0x4   :  { %15 = vsyncpa [#allocation3 + $0x1], 0 }
   0x5   :  { %16 = vsyncpa [#allocation6], 0 }
   0x6   :  { %17 = vsyncpa [#allocation9], 0 }
   0x7   :  { %18 = vsyncpa [#allocation12], 0 }
   0x8   :  { %19 = vsyncpa [#allocation15], 0 }
   0x9   :  { %20 = vsyncpa [#allocation4], 0 }
   0xa   :  { %22 = vsyncpa [#allocation4 + $0x1], 0  ;;  %s1478_s27 = smov 0   ;;  %s1480_s28 = smov 0  }
   0xb   :  { %s1482_s29 = smov 0   ;;  %s1484_s30 = smov 0  }
   0xc LB: > { %s1750_s1 = sld [smem:[#allocation23_spill]]  ;;  %s1502_s12 = sadd.s32 4294967295, %s1420_s30   ;;  %s1420_s30 = sphi %s1484_s30, %s1764_s30   ;;  %s1416_s29 = sphi %s1482_s29, %s1763_s29   ;;  %s1412_s28 = sphi %s1480_s28, %s1762_s28   ;;  %s1408_s27 = sphi %s1478_s27, %s1761_s27  }
   0xd   : > { %p916_p0 = scmp.ge.s32.totalorder %s1420_s30, 1  ;;  %p49_p1 = scmp.eq.s32.totalorder %s1502_s12, 0 }
   0xe   : > { %p232_p2 = scmp.lt.s32.totalorder %s1420_s30, 3  ;;  %s1422_s14 = smov [#allocation5]  }
   0xf   : > { %s245_s15 = sshll.u32 %s1422_s14, 4  ;;  %s271_s18 = sshll.u32 %s1740_s3, 4  ;;  %s246_s15 = int_to_ptr.vmem [resolvable:$true] %s245_s15  ;;  %s272_s18 = int_to_ptr.hbm [resolvable:$true] %s271_s18 }
  0x10   : > { %p1507_p3 = pnand %p916_p0, %p232_p2  ;;  %s299_s22 = sshll.u32 %s1742_s5, 4  ;;  %s300_s22 = int_to_ptr.hbm [resolvable:$true] %s299_s22 }
  0x11   : > { %s1423_s23 = smov [#allocation8]   ;;  %s1746_s25 = smov 128  }
  0x12   : > { %s243_s11 = sshll.u32 %s1750_s1, 4  ;;  %p1009_p4 = pneg %p1507_p3  ;;  %s244_s11 = int_to_ptr.hbm [resolvable:$true] %s243_s11 }
  0x13   : > { %s273_s24 = sshll.u32 %s1423_s23, 4  ;;  %s1747_s26 = smov 8   ;;  %s274_s24 = int_to_ptr.vmem [resolvable:$true] %s273_s24 }
  0x14   : > { %p1519_p6 = pnand %p1009_p4, %p49_p1  ;;  %s1753_s2 = sld [smem:[#allocation24_spill]] }
  0x15   : > { %s1426_s16 = smov [#allocation11]   ;;  %s313_s9 = sshll.u32 %s1743_s6, 4  ;;  %s314_s9 = int_to_ptr.hbm [resolvable:$true] %s313_s9 }
  0x16   : > { %1012 = dma.hbm_to_vmem [thread:$0]  (!%p1519_p6), %s244_s11, 2048, %s246_s15, [#allocation6], %s1746_s25, %s1746_s25, %s1747_s26  }
  0x17   : > { %1018 = dma.hbm_to_vmem [thread:$0]  (!%p1519_p6), %s272_s18, 2048, %s274_s24, [#allocation9], %s1746_s25, %s1746_s25, %s1747_s26  }
  0x18   : > { %s301_s17 = sshll.u32 %s1426_s16, 4  ;;  %s1427_s11 = smov [#allocation7]   ;;  %s302_s17 = int_to_ptr.vmem [resolvable:$true] %s301_s17 }
  0x19   : > { %1024 = dma.hbm_to_vmem [thread:$0]  (!%p1519_p6), %s300_s22, 2048, %s302_s17, [#allocation12], %s1746_s25, %s1746_s25, %s1747_s26  }
  0x1a   : > { %s257_s14 = sshll.u32 %s1753_s2, 4  ;;  %s259_s15 = sshll.u32 %s1427_s11, 4  ;;  %s258_s14 = int_to_ptr.hbm [resolvable:$true] %s257_s14  ;;  %s260_s15 = int_to_ptr.vmem [resolvable:$true] %s259_s15 }
  0x1b   : > { %s285_s18 = sshll.u32 %s1741_s4, 4  ;;  %s1428_s22 = smov [#allocation10]   ;;  %s286_s18 = int_to_ptr.hbm [resolvable:$true] %s285_s18 }
  0x1c   : > { %1015 = dma.hbm_to_vmem [thread:$0]  (!%p1519_p6), %s258_s14, 2048, %s260_s15, [#allocation6], %s1746_s25, %s1746_s25, %s1747_s26  }
  0x1d   : > { %s287_s10 = sshll.u32 %s1428_s22, 4  ;;  %s1429_s14 = smov [#allocation13]   ;;  %s288_s10 = int_to_ptr.vmem [resolvable:$true] %s287_s10 }
  0x1e   : > { %1021 = dma.hbm_to_vmem [thread:$0]  (!%p1519_p6), %s286_s18, 2048, %s288_s10, [#allocation9], %s1746_s25, %s1746_s25, %s1747_s26  }
  0x1f   : > { %s315_s16 = sshll.u32 %s1429_s14, 4  ;;  %s328_s15 = sshll.u32 %s1744_s7, 4  ;;  %s316_s16 = int_to_ptr.vmem [resolvable:$true] %s315_s16  ;;  %s329_s15 = int_to_ptr.hbm [resolvable:$true] %s328_s15 }
  0x20   : > { %1027 = dma.hbm_to_vmem [thread:$0]  (!%p1519_p6), %s314_s9, 2048, %s316_s16, [#allocation12], %s1746_s25, %s1746_s25, %s1747_s26  }
  0x21   : > { %s1430_s20 = smov [#allocation14]   ;;  %s915_s18 = sadd.s32 4294967294, %s1420_s30  }
  0x22   : > { %s330_s21 = sshll.u32 %s1430_s20, 4  ;;  %s1572_s23 = sadd.s32 1, %s1420_s30   ;;  %s331_s21 = int_to_ptr.vmem [resolvable:$true] %s330_s21 }
  0x23   : > { %1030 = dma.hbm_to_vmem [thread:$0]  (!%p1519_p6), %s329_s15, 128, %s331_s21, [#allocation15]  }
  0x24   : > { %s35_s24 = sadd.s32 1, %s1416_s29  ;;  %s32_s22 = ssub.s32 %s1420_s30, %s1572_s23 }
  0x25   : > { %p42_p7 = scmp.ne.s32.totalorder %s1416_s29, %s1412_s28  ;;  %p33_p8 = scmp.eq.s32.totalorder %s32_s22, 0 }
  0x26   : > { %p43_p9 = scmp.eq.s32.totalorder %s1420_s30, 0  ;;  %p48_p10 = scmp.ne.s32.totalorder %s1412_s28, %s1408_s27 }
  0x27   : > { %p219_p11 = scmp.eq.s32.totalorder %s1502_s12, 1  ;;  %p225_p0 = scmp.eq.s32.totalorder %s915_s18, 1 }
  0x28   : > { %s1584_s9 = scalar_select %p33_p8, %s1416_s29, %s35_s24  }
  0x29   : > { %p1588_p12 = por %p49_p1, %p48_p10  ;;  %p1592_p13 = por %p219_p11, %p42_p7 }
  0x2a   : > { %p44_p2 = por %p43_p9, %p42_p7  ;;  %s341_s14 = sand.u32 1, %s1416_s29  }
  0x2b   : > { %p1597_p4 = por %p225_p0, %p48_p10  ;;  %p1046_p6 = scmp.lt.s32.totalorder %s1420_s30, 2 }
  0x2c   : > { %s925_s17 = sshll.u32 %s341_s14, 5  ;;  %s943_s11 = sshll.u32 %s1420_s30, 5 }
  0x2d   : > { %s350_s21 = scalar_lea.hbm %s1737_s0, %s943_s11  ;;  %s345_s22 = scalar_lea.vmem [#allocation2], %s925_s17 }
  0x2e   : > { %s351_s24 = sshll.u32 %s350_s21, 4  ;;  %s353_s25 = sshll.u32 %s345_s22, 4  ;;  %s352_s24 = int_to_ptr.hbm [resolvable:$true] %s351_s24  ;;  %s354_s25 = int_to_ptr.vmem [resolvable:$true] %s353_s25 }
  0x2f   : > { %p1606_p8 = pnand %p1046_p6, %p44_p2  ;;  %s342_s26 = scalar_lea.sflag [#allocation3], %s341_s14 }
  0x30   : > { %s1308_s1 = sshra.s32 %s352_s24, 4  ;;  %s1315_s17 = scalar_lea.hbm %s1737_s0, 64  ;;  %s1309_s1 = int_to_ptr.hbm [resolvable:$true] %s1308_s1 }
  0x31   : > { %s1310_s2 = scalar_lea.hbm %s1309_s1, 32  ;;  %p1312_p9 = pneg %p1606_p8 }
  0x32   : > { %p1311_p7 = scmp.ne.s32.totalorder %s1309_s1, %s1310_s2  ;;  %p1316_p0 = scmp.lt.s32.totalorder %s1309_s1, %s1737_s0 }
  0x33   : > { %p1317_p2 = scmp.lt.s32.totalorder %s1315_s17, %s1310_s2 }
  0x34   : > { %p1313_p10 = pnand %p1312_p9, %p1311_p7 }
  0x35   : > { %p1318_p6 = por %p1317_p2, %p1316_p0 }
  0x36   : > { %p1314_p11 = pneg %p1313_p10 }
  0x38   : > { %p1319_p5 = pnand %p1318_p6, %p1314_p11 }
  0x3a   : > { %1322 = shalt.err (!%p1319_p5)
}
  0x3b   : > { %s1758_s14 = smov 8   ;;  %s1759_s22 = smov 128  }
  0x3c   : > { %1034 = dma.hbm_to_vmem [thread:$0]  (!%p1606_p8), %s352_s24, 512, %s354_s25, %s342_s26, %s1759_s22, %s1759_s22, %s1758_s14  }
  0x3d   : > { %365 = sbr.rel (%p1507_p3) target bundleno = 943 (0x3af), region = 52  ;;  %s1626_s11 = sand.u32 (!%p1507_p3), 1, %s1412_s28  }
  0x3e   : > { %s929_s1 = sshll.u32 (!%p1507_p3), %s1626_s11, 5  ;;  %s368_s2 = scalar_lea.sflag (!%p1507_p3), [#allocation3], %s1626_s11 }
  0x3f   : > { %s1632_s15 = scalar_lea.vmem (!%p1507_p3), [#allocation2], %s929_s1 }
  0x42   : > { %1383 = dma.done.wait (%p1588_p12), %s368_s2, 512  }
  0x43   : > { %1385 = vsyncadd (%p1588_p12), %s368_s2, 4294966784 }
  0x44   : > { %1387 = dma.done.wait (%p49_p1), [#allocation6], 4096  }
  0x45   : > { %1389 = vsyncadd (%p49_p1), [#allocation6], 4294963200 }
  0x46   : > { %1391 = dma.done.wait (%p49_p1), [#allocation9], 4096  }
  0x47   : > { %1393 = vsyncadd (%p49_p1), [#allocation9], 4294963200 }
  0x48   : > { %1395 = dma.done.wait (%p49_p1), [#allocation12], 4096  }
  0x49   : > { %1397 = vsyncadd (%p49_p1), [#allocation12], 4294963200 }
  0x4a   : > { %1399 = dma.done.wait (%p49_p1), [#allocation15], 128  }
  0x4b   : > { %1401 = vsyncadd (%p49_p1), [#allocation15], 4294967168  ;;  %v462_v0 = vld [vmem:[#allocation5 + $0x78] sm:$0xff]  ;;  %v461_v1 = vld [vmem:[#allocation5 + $0x70] sm:$0xff]  ;;  %s439_s13 = scalar_lea.vmem [#allocation16], %s929_s1  ;;  %s944_s25 = sshll.u32 %s1502_s12, 5 }
  0x4c   : > { %464 = vmatpush.msra.mxu0 %v462_v0  ;;  %v460_v2 = vld [vmem:[#allocation5 + $0x68] sm:$0xff]  ;;  %v459_v3 = vld [vmem:[#allocation5 + $0x60] sm:$0xff]  ;;  %v458_v4 = vld [vmem:[#allocation5 + $0x58] sm:$0xff]  ;;  %s771_s24 = scalar_lea.hbm %s1745_s8, %s944_s25  ;;  %s772_s18 = sshll.u32 %s439_s13, 4  ;;  %s773_s18 = int_to_ptr.vmem [resolvable:$true] %s772_s18 }
  0x4d   : > { %v457_v5 = vld [vmem:[#allocation5 + $0x50] sm:$0xff]  ;;  %v456_v6 = vld [vmem:[#allocation5 + $0x48] sm:$0xff]  ;;  %v455_v7 = vld [vmem:[#allocation5 + $0x40] sm:$0xff]  ;;  %s774_s17 = sshll.u32 %s771_s24, 4  ;;  %s760_s20 = scalar_lea.sflag [#allocation4], %s1626_s11  ;;  %s775_s17 = int_to_ptr.hbm [resolvable:$true] %s774_s17 }
  0x4e   : > { %465 = vmatpush.msra.mxu0 %v461_v1  ;;  %v454_v8 = vld [vmem:[#allocation5 + $0x38] sm:$0xff]  ;;  %v453_v9 = vld [vmem:[#allocation5 + $0x30] sm:$0xff]  ;;  %v452_v10 = vld [vmem:[#allocation5 + $0x28] sm:$0xff]  ;;  %s1352_s21 = sshra.s32 %s775_s17, 4  ;;  %s1358_s1 = scalar_lea.hbm %s1745_s8, 64  ;;  %s1353_s21 = int_to_ptr.hbm [resolvable:$true] %s1352_s21 }
  0x4f   : > { %v451_v11 = vld [vmem:[#allocation5 + $0x20] sm:$0xff]  ;;  %v450_v12 = vld [vmem:[#allocation5 + $0x18] sm:$0xff]  ;;  %v449_v13 = vld [vmem:[#allocation5 + $0x10] sm:$0xff]  ;;  %s1354_s12 = scalar_lea.hbm %s1353_s21, 32  ;;  %p1359_p12 = scmp.lt.s32.totalorder %s1353_s21, %s1745_s8 }
  0x50   : > { %466 = vmatpush.msra.mxu0 %v460_v2  ;;  %v512_v14 = vld [vmem:[#allocation7 + $0x78] sm:$0xff]  ;;  %v511_v15 = vld [vmem:[#allocation7 + $0x70] sm:$0xff]  ;;  %v448_v16 = vld [vmem:[#allocation5 + $0x8] sm:$0xff]  ;;  %p1355_p1 = scmp.ne.s32.totalorder %s1353_s21, %s1354_s12  ;;  %p1360_p8 = scmp.lt.s32.totalorder %s1358_s1, %s1354_s12 }
  0x51   : > { %514 = vmatpush.msra.mxu1 %v512_v14  ;;  %v510_v17 = vld [vmem:[#allocation7 + $0x68] sm:$0xff]  ;;  %v447_v18 = vld [vmem:[#allocation5] sm:$0xff]  ;;  %v508_v21 = vld [vmem:[#allocation7 + $0x58] sm:$0xff] }
  0x52   : > { %467 = vmatpush.msra.mxu0 %v459_v3  ;;  %v509_v19 = vld [vmem:[#allocation7 + $0x60] sm:$0xff]  ;;  %v507_v22 = vld [vmem:[#allocation7 + $0x50] sm:$0xff]  ;;  %v506_v23 = vld [vmem:[#allocation7 + $0x48] sm:$0xff]  ;;  %p1356_p3 = pnand %p1355_p1, %p1592_p13  ;;  %p1361_p7 = por %p1360_p8, %p1359_p12 }
  0x53   : > { %515 = vmatpush.msra.mxu1 %v511_v15  ;;  %v443_v20 = vld [vmem:[%s1632_s15] sm:$0xff]  ;;  %v444_v25 = vld [vmem:[%s1632_s15 + $0x8] sm:$0xff]  ;;  %v504_v26 = vld [vmem:[#allocation7 + $0x38] sm:$0xff] }
  0x54   : > { %468 = vmatpush.msra.mxu0 %v458_v4  ;;  %v505_v24 = vld [vmem:[#allocation7 + $0x40] sm:$0xff]  ;;  %v503_v27 = vld [vmem:[#allocation7 + $0x30] sm:$0xff]  ;;  %v502_v28 = vld [vmem:[#allocation7 + $0x28] sm:$0xff]  ;;  %p1357_p5 = pneg %p1356_p3 }
  0x55   : > { %516 = vmatpush.msra.mxu1 %v510_v17  ;;  %v501_v29 = vld [vmem:[#allocation7 + $0x20] sm:$0xff]  ;;  %v445_v30 = vld [vmem:[%s1632_s15 + $0x10] sm:$0xff]  ;;  %v500_v31 = vld [vmem:[#allocation7 + $0x18] sm:$0xff] }
  0x56   : > { %469 = vmatpush.msra.mxu0 %v457_v5  ;;  %v446_v32 = vld [vmem:[%s1632_s15 + $0x18] sm:$0xff]  ;;  %v499_v33 = vld [vmem:[#allocation7 + $0x10] sm:$0xff]  ;;  %v498_v34 = vld [vmem:[#allocation7 + $0x8] sm:$0xff]  ;;  %p1362_p9 = pnand %p1361_p7, %p1357_p5 }
  0x57   : > { %517 = vmatpush.msra.mxu1 %v509_v19  ;;  %v497_v35 = vld [vmem:[#allocation7] sm:$0xff]  ;;  %v562_v38 = vld [vmem:[#allocation8 + $0x78] sm:$0xff]  ;;  %v561_v39 = vld [vmem:[#allocation8 + $0x70] sm:$0xff] }
  0x58   : > { %470 = vmatpush.msra.mxu0 %v456_v6  ;;  %v1658_v36 = vld [vmem:[#allocation14] sm:$0x3f]  ;;  %564 = vmatpush.msra.mxu2 %v562_v38  ;;  %v560_v40 = vld [vmem:[#allocation8 + $0x68] sm:$0xff]  ;;  %v558_v45 = vld [vmem:[#allocation8 + $0x58] sm:$0xff] }
  0x59   : > { %518 = vmatpush.msra.mxu1 %v508_v21  ;;  %v463_v37 = vperm.slane %v1658_v36, 0  ;;  %v559_v43 = vld [vmem:[#allocation8 + $0x60] sm:$0xff]  ;;  %v557_v46 = vld [vmem:[#allocation8 + $0x50] sm:$0xff]  ;;  %v556_v47 = vld [vmem:[#allocation8 + $0x48] sm:$0xff]  ;;  %v513_v2 = vperm.slane %v1658_v36, 1 }
  0x5a   : > { %471 = vmatpush.msra.mxu0 %v455_v7  ;;  %565 = vmatpush.msra.mxu2 %v561_v39  ;;  %v555_v50 = vld [vmem:[#allocation8 + $0x40] sm:$0xff]  ;;  %v554_v52 = vld [vmem:[#allocation8 + $0x38] sm:$0xff]  ;;  %v553_v53 = vld [vmem:[#allocation8 + $0x30] sm:$0xff] }
  0x5b   : > { %519 = vmatpush.msra.mxu1 %v507_v22  ;;  %v552_v54 = vld [vmem:[#allocation8 + $0x28] sm:$0xff]  ;;  %v551_v57 = vld [vmem:[#allocation8 + $0x20] sm:$0xff]  ;;  %v550_v59 = vld [vmem:[#allocation8 + $0x18] sm:$0xff] }
  0x5c   : > { %472 = vmatpush.msra.mxu0 %v454_v8  ;;  %566 = vmatpush.msra.mxu2 %v560_v40  ;;  %v549_v63 = vld [vmem:[#allocation8 + $0x10] sm:$0xff]  ;;  %v548_v0 = vld [vmem:[#allocation8 + $0x8] sm:$0xff]  ;;  %v547_v1 = vld [vmem:[#allocation8] sm:$0xff] }
  0x5d   : > { %520 = vmatpush.msra.mxu1 %v506_v23  ;;  %v612_v3 = vld [vmem:[#allocation10 + $0x78] sm:$0xff]  ;;  %v611_v4 = vld [vmem:[#allocation10 + $0x70] sm:$0xff]  ;;  %v610_v5 = vld [vmem:[#allocation10 + $0x68] sm:$0xff] }
  0x5e   : > { %473 = vmatpush.msra.mxu0 %v453_v9  ;;  %567 = vmatpush.msra.mxu2 %v559_v43  ;;  %v609_v8 = vld [vmem:[#allocation10 + $0x60] sm:$0xff]  ;;  %v604_v17 = vld [vmem:[#allocation10 + $0x38] sm:$0xff]  ;;  %v602_v19 = vld [vmem:[#allocation10 + $0x28] sm:$0xff] }
  0x5f   : > { %521 = vmatpush.msra.mxu1 %v505_v24  ;;  %614 = vmatpush.msra.mxu3 %v612_v3  ;;  %v605_v15 = vld [vmem:[#allocation10 + $0x40] sm:$0xff]  ;;  %v600_v24 = vld [vmem:[#allocation10 + $0x18] sm:$0xff] }
  0x60   : > { %474 = vmatpush.msra.mxu0 %v452_v10  ;;  %568 = vmatpush.msra.mxu2 %v558_v45  ;;  %v608_v10 = vld [vmem:[#allocation10 + $0x58] sm:$0xff]  ;;  %v601_v22 = vld [vmem:[#allocation10 + $0x20] sm:$0xff] }
  0x61   : > { %522 = vmatpush.msra.mxu1 %v504_v26  ;;  %615 = vmatpush.msra.mxu3 %v611_v4  ;;  %v663_v38 = vld [vmem:[#allocation11 + $0x60] sm:$0xff]  ;;  %v662_v40 = vld [vmem:[#allocation11 + $0x58] sm:$0xff] }
  0x62   : > { %475 = vmatpush.msra.mxu0 %v451_v11  ;;  %569 = vmatpush.msra.mxu2 %v557_v46  ;;  %v607_v11 = vld [vmem:[#allocation10 + $0x50] sm:$0xff]  ;;  %v659_v45 = vld [vmem:[#allocation11 + $0x40] sm:$0xff] }
  0x63   : > { %523 = vmatpush.msra.mxu1 %v503_v27  ;;  %616 = vmatpush.msra.mxu3 %v610_v5  ;;  %v713_v4 = vld [vmem:[#allocation13 + $0x60] sm:$0xff] }
  0x64   : > { %476 = vmatpush.msra.mxu0 %v450_v12  ;;  %570 = vmatpush.msra.mxu2 %v556_v47  ;;  %v606_v12 = vld [vmem:[#allocation10 + $0x48] sm:$0xff]  ;;  %v658_v47 = vld [vmem:[#allocation11 + $0x38] sm:$0xff] }
  0x65   : > { %524 = vmatpush.msra.mxu1 %v502_v28  ;;  %617 = vmatpush.msra.mxu3 %v609_v8  ;;  %v599_v28 = vld [vmem:[#allocation10 + $0x10] sm:$0xff] }
  0x66   : > { %477 = vmatpush.msra.mxu0 %v449_v13  ;;  %571 = vmatpush.msra.mxu2 %v555_v50  ;;  %v711_v8 = vld [vmem:[#allocation13 + $0x50] sm:$0xff] }
  0x67   : > { %525 = vmatpush.msra.mxu1 %v501_v29  ;;  %618 = vmatpush.msra.mxu3 %v608_v10  ;;  %v598_v29 = vld [vmem:[#allocation10 + $0x8] sm:$0xff] }
  0x68   : > { %478 = vmatpush.msra.mxu0 %v448_v16  ;;  %572 = vmatpush.msra.mxu2 %v554_v52  ;;  %v655_v52 = vld [vmem:[#allocation11 + $0x20] sm:$0xff] }
  0x69   : > { %526 = vmatpush.msra.mxu1 %v500_v31  ;;  %619 = vmatpush.msra.mxu3 %v607_v11  ;;  %v563_v31 = vperm.slane %v1658_v36, 2 }
  0x6a   : > { %479 = vmatpush.msra.mxu0 %v447_v18  ;;  %573 = vmatpush.msra.mxu2 %v553_v53  ;;  %v603_v18 = vld [vmem:[#allocation10 + $0x30] sm:$0xff] }
  0x6b   : > { %480 = vmatmul.f32.vlgmr.msra.gmra.mxu0 %v443_v20  ;;  %527 = vmatpush.msra.mxu1 %v499_v33  ;;  %v665_v33 = vld [vmem:[#allocation11 + $0x70] sm:$0xff] }
  0x6c   : > { %574 = vmatpush.msra.mxu2 %v552_v54  ;;  %620 = vmatpush.msra.mxu3 %v606_v12  ;;  %v710_v12 = vld [vmem:[#allocation13 + $0x48] sm:$0xff] }
  0x6d   : > { %528 = vmatpush.msra.mxu1 %v498_v34  ;;  %v664_v34 = vld [vmem:[#allocation11 + $0x68] sm:$0xff] }
  0x6e   : > { %575 = vmatpush.msra.mxu2 %v551_v57  ;;  %621 = vmatpush.msra.mxu3 %v605_v15  ;;  %v654_v57 = vld [vmem:[#allocation11 + $0x18] sm:$0xff]  ;;  %v709_v15 = vld [vmem:[#allocation13 + $0x40] sm:$0xff] }
  0x6f   : > { %529 = vmatpush.msra.mxu1 %v497_v35 }
  0x70   : > { %576 = vmatpush.msra.mxu2 %v550_v59  ;;  %622 = vmatpush.msra.mxu3 %v604_v17  ;;  %v652_v59 = vld [vmem:[#allocation11 + $0x8] sm:$0xff]  ;;  %v707_v17 = vld [vmem:[#allocation13 + $0x30] sm:$0xff] }
  0x72   : > { %577 = vmatpush.msra.mxu2 %v549_v63  ;;  %623 = vmatpush.msra.mxu3 %v603_v18  ;;  %v715_v63 = vld [vmem:[#allocation13 + $0x70] sm:$0xff] }
  0x73   : > { %483 = vmatmul.f32.gmra.mxu0 %v444_v25 }
  0x74   : > { %578 = vmatpush.msra.mxu2 %v548_v0  ;;  %624 = vmatpush.msra.mxu3 %v602_v19 }
  0x76   : > { %579 = vmatpush.msra.mxu2 %v547_v1  ;;  %625 = vmatpush.msra.mxu3 %v601_v22 }
  0x78   : > { %626 = vmatpush.msra.mxu3 %v600_v24  ;;  %v705_v24 = vld [vmem:[#allocation13 + $0x20] sm:$0xff] }
  0x7a   : > { %627 = vmatpush.msra.mxu3 %v599_v28 }
  0x7b   : > { %486 = vmatmul.f32.gmra.mxu0 %v445_v30  ;;  %v597_v30 = vld [vmem:[#allocation10] sm:$0xff] }
  0x7c   : > { %628 = vmatpush.msra.mxu3 %v598_v29 }
  0x7e   : > { %629 = vmatpush.msra.mxu3 %v597_v30 }
  0x83   : > { %489 = vmatmul.f32.gmra.mxu0 %v446_v32  ;;  %v666_v32 = vld [vmem:[#allocation11 + $0x78] sm:$0xff] }
  0x84   : > { %668 = vmatpush.msrb.mxu0 %v666_v32  ;;  %945 = vmatpush.msrb.mxu2 %v666_v32  ;;  %v702_v32 = vld [vmem:[#allocation13 + $0x8] sm:$0xff] }
  0x86   : > { %669 = vmatpush.msrb.mxu0 %v665_v33  ;;  %946 = vmatpush.msrb.mxu2 %v665_v33 }
  0x88   : > { %670 = vmatpush.msrb.mxu0 %v664_v34  ;;  %947 = vmatpush.msrb.mxu2 %v664_v34 }
  0x8a   : > { %671 = vmatpush.msrb.mxu0 %v663_v38  ;;  %948 = vmatpush.msrb.mxu2 %v663_v38 }
  0x8c   : > { %672 = vmatpush.msrb.mxu0 %v662_v40  ;;  %949 = vmatpush.msrb.mxu2 %v662_v40 }
  0xe8   : > { %v481_v41 = vpop.f32.mrf.mxu0 }
  0xe9   : > { %v482_v42 = vadd.f32 %v481_v41, %v463_v37  ;;  %v661_v41 = vld [vmem:[#allocation11 + $0x50] sm:$0xff] }
  0xea   : > { %673 = vmatpush.msrb.mxu0 %v661_v41  ;;  %950 = vmatpush.msrb.mxu2 %v661_v41 }
  0xeb   : > { %v493_v44 = vmax.f32 %v482_v42, 0.0  ;;  %v660_v42 = vld [vmem:[#allocation11 + $0x48] sm:$0xff] }
  0xec   : > { %674 = vmatpush.msrb.mxu0 %v660_v42  ;;  %951 = vmatpush.msrb.mxu2 %v660_v42 }
  0xed   : > { %530 = vmatmul.f32.vlgmr.msra.gmra.mxu1 %v493_v44 }
  0xee   : > { %675 = vmatpush.msrb.mxu0 %v659_v45  ;;  %952 = vmatpush.msrb.mxu2 %v659_v45 }
  0xf0   : > { %v484_v48 = vpop.f32.mrf.mxu0  ;;  %676 = vmatpush.msrb.mxu0 %v658_v47  ;;  %953 = vmatpush.msrb.mxu2 %v658_v47 }
  0xf1   : > { %v485_v49 = vadd.f32 %v484_v48, %v463_v37  ;;  %v657_v48 = vld [vmem:[#allocation11 + $0x30] sm:$0xff] }
  0xf2   : > { %677 = vmatpush.msrb.mxu0 %v657_v48  ;;  %954 = vmatpush.msrb.mxu2 %v657_v48 }
  0xf3   : > { %v494_v51 = vmax.f32 %v485_v49, 0.0  ;;  %v656_v49 = vld [vmem:[#allocation11 + $0x28] sm:$0xff] }
  0xf4   : > { %678 = vmatpush.msrb.mxu0 %v656_v49  ;;  %955 = vmatpush.msrb.mxu2 %v656_v49 }
  0xf5   : > { %533 = vmatmul.f32.gmra.mxu1 %v494_v51 }
  0xf6   : > { %679 = vmatpush.msrb.mxu0 %v655_v52  ;;  %956 = vmatpush.msrb.mxu2 %v655_v52 }
  0xf8   : > { %v487_v55 = vpop.f32.mrf.mxu0  ;;  %680 = vmatpush.msrb.mxu0 %v654_v57  ;;  %957 = vmatpush.msrb.mxu2 %v654_v57 }
  0xf9   : > { %v488_v56 = vadd.f32 %v487_v55, %v463_v37 }
  0xfb   : > { %v495_v58 = vmax.f32 %v488_v56, 0.0 }
  0xfd   : > { %536 = vmatmul.f32.gmra.mxu1 %v495_v58  ;;  %v653_v58 = vld [vmem:[#allocation11 + $0x10] sm:$0xff] }
  0xfe   : > { %681 = vmatpush.msrb.mxu0 %v653_v58  ;;  %958 = vmatpush.msrb.mxu2 %v653_v58 }
 0x100   : > { %v490_v60 = vpop.f32.mrf.mxu0  ;;  %682 = vmatpush.msrb.mxu0 %v652_v59  ;;  %959 = vmatpush.msrb.mxu2 %v652_v59 }
 0x101   : > { %v491_v61 = vadd.f32 %v490_v60, %v463_v37  ;;  %v651_v60 = vld [vmem:[#allocation11] sm:$0xff] }
 0x102   : > { %683 = vmatpush.msrb.mxu0 %v651_v60  ;;  %960 = vmatpush.msrb.mxu2 %v651_v60 }
 0x103   : > { %v496_v62 = vmax.f32 %v491_v61, 0.0  ;;  %v613_v61 = vperm.slane %v1658_v36, 3 }
 0x105   : > { %539 = vmatmul.f32.gmra.mxu1 %v496_v62  ;;  %v716_v62 = vld [vmem:[#allocation13 + $0x78] sm:$0xff] }
 0x106   : > { %718 = vmatpush.msrb.mxu1 %v716_v62  ;;  %961 = vmatpush.msrb.mxu3 %v716_v62 }
 0x108   : > { %719 = vmatpush.msrb.mxu1 %v715_v63  ;;  %962 = vmatpush.msrb.mxu3 %v715_v63 }
 0x16a   : > { %v531_v6 = vpop.f32.mrf.mxu1 }
 0x16b   : > { %v1662_v7 = vadd.f32 %v531_v6, %v513_v2  ;;  %v712_v6 = vld [vmem:[#allocation13 + $0x58] sm:$0xff] }
 0x16d   : > { %v543_v9 = vmax.f32 %v1662_v7, 0.0 }
 0x16f   : > { %580 = vmatmul.f32.vlgmr.msra.gmra.mxu2 %v543_v9 }
 0x172   : > { %v534_v13 = vpop.f32.mrf.mxu1 }
 0x173   : > { %v1667_v14 = vadd.f32 %v534_v13, %v513_v2 }
 0x175   : > { %v544_v16 = vmax.f32 %v1667_v14, 0.0 }
 0x177   : > { %583 = vmatmul.f32.gmra.mxu2 %v544_v16 }
 0x17a   : > { %v537_v20 = vpop.f32.mrf.mxu1 }
 0x17b   : > { %v1672_v21 = vadd.f32 %v537_v20, %v513_v2  ;;  %v706_v20 = vld [vmem:[#allocation13 + $0x28] sm:$0xff] }
 0x17d   : > { %v545_v23 = vmax.f32 %v1672_v21, 0.0  ;;  %v701_v21 = vld [vmem:[#allocation13] sm:$0xff] }
 0x17f   : > { %586 = vmatmul.f32.gmra.mxu2 %v545_v23 }
 0x182   : > { %v540_v25 = vpop.f32.mrf.mxu1 }
 0x183   : > { %v1677_v26 = vadd.f32 %v540_v25, %v513_v2  ;;  %v714_v2 = vld [vmem:[#allocation13 + $0x68] sm:$0xff] }
 0x184   : > { %720 = vmatpush.msrb.mxu1 %v714_v2  ;;  %963 = vmatpush.msrb.mxu3 %v714_v2 }
 0x185   : > { %v546_v27 = vmax.f32 %v1677_v26, 0.0 }
 0x186   : > { %721 = vmatpush.msrb.mxu1 %v713_v4  ;;  %964 = vmatpush.msrb.mxu3 %v713_v4 }
 0x187   : > { %589 = vmatmul.f32.gmra.mxu2 %v546_v27 }
 0x188   : > { %722 = vmatpush.msrb.mxu1 %v712_v6  ;;  %965 = vmatpush.msrb.mxu3 %v712_v6 }
 0x18a   : > { %723 = vmatpush.msrb.mxu1 %v711_v8  ;;  %966 = vmatpush.msrb.mxu3 %v711_v8 }
 0x18c   : > { %724 = vmatpush.msrb.mxu1 %v710_v12  ;;  %967 = vmatpush.msrb.mxu3 %v710_v12 }
 0x18e   : > { %725 = vmatpush.msrb.mxu1 %v709_v15  ;;  %968 = vmatpush.msrb.mxu3 %v709_v15 }
 0x1f2   : > { %v581_v35 = vpop.f32.mrf.mxu2 }
 0x1f3   : > { %v582_v37 = vadd.f32 %v581_v35, %v563_v31 }
 0x1f5   : > { %v593_v39 = vmax.f32 %v582_v37, 0.0 }
 0x1f7   : > { %630 = vmatmul.f32.vlgmr.msra.gmra.mxu3 %v593_v39 }
 0x1fa   : > { %v584_v43 = vpop.f32.mrf.mxu2 }
 0x1fb   : > { %v585_v44 = vadd.f32 %v584_v43, %v563_v31 }
 0x1fd   : > { %v594_v46 = vmax.f32 %v585_v44, 0.0  ;;  %v717_v44 = vperm.slane %v1658_v36, 5 }
 0x1ff   : > { %633 = vmatmul.f32.gmra.mxu3 %v594_v46 }
 0x202   : > { %v587_v50 = vpop.f32.mrf.mxu2 }
 0x203   : > { %v588_v51 = vadd.f32 %v587_v50, %v563_v31 }
 0x205   : > { %v595_v53 = vmax.f32 %v588_v51, 0.0 }
 0x207   : > { %636 = vmatmul.f32.gmra.mxu3 %v595_v53 }
 0x20a   : > { %v590_v54 = vpop.f32.mrf.mxu2 }
 0x20b   : > { %v591_v55 = vadd.f32 %v590_v54, %v563_v31  ;;  %v703_v31 = vld [vmem:[#allocation13 + $0x10] sm:$0xff] }
 0x20d   : > { %v596_v56 = vmax.f32 %v591_v55, 0.0 }
 0x20f   : > { %639 = vmatmul.f32.gmra.mxu3 %v596_v56 }
 0x27a   : > { %v631_v0 = vpop.f32.mrf.mxu3 }
 0x27b   : > { %v632_v1 = vadd.f32 %v631_v0, %v613_v61 }
 0x27d   : > { %v643_v3 = vmax.f32 %v632_v1, 0.0 }
 0x27f   : > { %v1686_v5 = vadd.f32 %v643_v3, %v543_v9  ;;  %v708_v9 = vld [vmem:[#allocation13 + $0x38] sm:$0xff] }
 0x280   : > { %726 = vmatpush.msrb.mxu1 %v708_v9  ;;  %969 = vmatpush.msrb.mxu3 %v708_v9 }
 0x281   : > { %684 = vmatmul.f32.vlgmr.msrb.gmra.mxu0 %v1686_v5 }
 0x282   : > { %v634_v10 = vpop.f32.mrf.mxu3  ;;  %727 = vmatpush.msrb.mxu1 %v707_v17  ;;  %970 = vmatpush.msrb.mxu3 %v707_v17 }
 0x283   : > { %v635_v11 = vadd.f32 %v634_v10, %v613_v61 }
 0x284   : > { %728 = vmatpush.msrb.mxu1 %v706_v20  ;;  %971 = vmatpush.msrb.mxu3 %v706_v20 }
 0x285   : > { %v644_v13 = vmax.f32 %v635_v11, 0.0 }
 0x286   : > { %729 = vmatpush.msrb.mxu1 %v705_v24  ;;  %972 = vmatpush.msrb.mxu3 %v705_v24 }
 0x287   : > { %v1691_v7 = vadd.f32 %v644_v13, %v544_v16  ;;  %v704_v16 = vld [vmem:[#allocation13 + $0x18] sm:$0xff] }
 0x288   : > { %730 = vmatpush.msrb.mxu1 %v704_v16  ;;  %973 = vmatpush.msrb.mxu3 %v704_v16 }
 0x289   : > { %687 = vmatmul.f32.gmra.mxu0 %v1691_v7 }
 0x28a   : > { %v637_v18 = vpop.f32.mrf.mxu3  ;;  %731 = vmatpush.msrb.mxu1 %v703_v31  ;;  %974 = vmatpush.msrb.mxu3 %v703_v31 }
 0x28b   : > { %v638_v19 = vadd.f32 %v637_v18, %v613_v61 }
 0x28c   : > { %732 = vmatpush.msrb.mxu1 %v702_v32  ;;  %975 = vmatpush.msrb.mxu3 %v702_v32 }
 0x28d   : > { %v645_v22 = vmax.f32 %v638_v19, 0.0 }
 0x28e   : > { %733 = vmatpush.msrb.mxu1 %v701_v21  ;;  %976 = vmatpush.msrb.mxu3 %v701_v21 }
 0x28f   : > { %v649_v14 = vadd.f32 %v645_v22, %v545_v23  ;;  %v667_v23 = vperm.slane %v1658_v36, 4 }
 0x291   : > { %690 = vmatmul.f32.vlgmr.msrb.gmra.mxu2 %v649_v14 }
 0x292   : > { %v640_v25 = vpop.f32.mrf.mxu3 }
 0x293   : > { %v641_v28 = vadd.f32 %v640_v25, %v613_v61 }
 0x295   : > { %v646_v29 = vmax.f32 %v641_v28, 0.0 }
 0x297   : > { %v650_v30 = vadd.f32 %v646_v29, %v546_v27 }
 0x299   : > { %693 = vmatmul.f32.gmra.mxu2 %v650_v30 }
 0x2fe   : > { %v685_v33 = vpop.f32.mrf.mxu0 }
 0x2ff   : > { %v686_v34 = vadd.f32 %v685_v33, %v667_v23 }
 0x301   : > { %v697_v35 = vmax.f32 %v686_v34, 0.0 }
 0x303   : > { %734 = vmatmul.f32.vlgmr.msrb.gmra.mxu1 %v697_v35 }
 0x306   : > { %v688_v37 = vpop.f32.mrf.mxu0 }
 0x307   : > { %v689_v38 = vadd.f32 %v688_v37, %v667_v23 }
 0x309   : > { %v698_v26 = vmax.f32 %v689_v38, 0.0 }
 0x30b   : > { %737 = vmatmul.f32.gmra.mxu1 %v698_v26 }
 0x314   : > { %v691_v27 = vpop.f32.mrf.mxu2 }
 0x315   : > { %v692_v39 = vadd.f32 %v691_v27, %v667_v23 }
 0x317   : > { %v699_v40 = vmax.f32 %v692_v39, 0.0 }
 0x319   : > { %740 = vmatmul.f32.vlgmr.msrb.gmra.mxu3 %v699_v40 }
 0x31c   : > { %v694_v41 = vpop.f32.mrf.mxu2 }
 0x31d   : > { %v695_v42 = vadd.f32 %v694_v41, %v667_v23 }
 0x31f   : > { %v700_v43 = vmax.f32 %v695_v42, 0.0 }
 0x321   : > { %743 = vmatmul.f32.gmra.mxu3 %v700_v43 }
 0x380   : > { %v735_v45 = vpop.f32.mrf.mxu1 }
 0x381   : > { %v736_v46 = vadd.f32 %v735_v45, %v717_v44 }
 0x383   : > { %v747_v47 = vmax.f32 %v736_v46, 0.0 }
 0x385   : > { %v751_v48 = vadd.f32 %v747_v47, %v1686_v5 }
 0x387   : > { %755 = vst [vmem:[%s439_s13] sm:$0xff] %v751_v48 }
 0x388   : > { %v738_v49 = vpop.f32.mrf.mxu1 }
 0x389   : > { %v739_v50 = vadd.f32 %v738_v49, %v717_v44 }
 0x38b   : > { %v748_v51 = vmax.f32 %v739_v50, 0.0 }
 0x38d   : > { %v752_v52 = vadd.f32 %v748_v51, %v1691_v7 }
 0x38f   : > { %756 = vst [vmem:[%s439_s13 + $0x8] sm:$0xff] %v752_v52 }
 0x39c   : > { %v741_v53 = vpop.f32.mrf.mxu3 }
 0x39d   : > { %v742_v54 = vadd.f32 %v741_v53, %v717_v44 }
 0x39f   : > { %v749_v55 = vmax.f32 %v742_v54, 0.0 }
 0x3a1   : > { %v753_v36 = vadd.f32 %v749_v55, %v649_v14 }
 0x3a3   : > { %757 = vst [vmem:[%s439_s13 + $0x10] sm:$0xff] %v753_v36 }
 0x3a4   : > { %v744_v56 = vpop.f32.mrf.mxu3 }
 0x3a5   : > { %v745_v57 = vadd.f32 %v744_v56, %v717_v44 }
 0x3a7   : > { %v750_v58 = vmax.f32 %v745_v57, 0.0 }
 0x3a9   : > { %v754_v59 = vadd.f32 %v750_v58, %v650_v30 }
 0x3ab   : > { %758 = vst [vmem:[%s439_s13 + $0x18] sm:$0xff] %v754_v59 }
 0x3ac   : > { %1365 = shalt.err (!%p1362_p9)
}
 0x3ad   : > { %s1431_s11 = smov 128   ;;  %s1432_s13 = smov 8  }
 0x3ae   : > { %1007 = dma.vmem_to_hbm [thread:$0]  (%p1592_p13), %s773_s18, 512, %s775_s17, %s760_s20, %s1431_s11, %s1431_s11, %s1432_s13  }
 0x3af PF: > { %s789_s25 = sand.u32 1, %s1408_s27   ;;  %p1760_p10 = scmp.ge.s32.totalorder %s1420_s30, 2 }
 0x3b0   : > { %s790_s26 = scalar_lea.sflag [#allocation4], %s789_s25 }
 0x3b1   : > { %p1036_p11 = pnand %p1760_p10, %p1597_p4 }
 0x3b3   : > { %p1037_p0 = pneg %p1036_p11 }
 0x3b5   : > { %1403 = dma.done.wait (%p1037_p0), %s790_s26, 512  }
 0x3b6   : > { %1405 = vsyncadd (%p1037_p0), %s790_s26, 4294966784  ;;  %p25_p2 = scmp.ge.s32.totalorder %s1572_s23, 4   ;;  %s1761_s27 = smov %s1412_s28 }
 0x3b7   : > { %s1762_s28 = smov %s1416_s29  ;;  %s1763_s29 = smov %s1584_s9 }
 0x3b8   : > { %s1764_s30 = smov %s1572_s23  ;;  %27 = sbr.rel (!%p25_p2) target bundleno = 12 (0xc), region = 125 }
 0x3bd   :  { %796 = vsyncpa [#allocation3], 1 }
 0x3be   :  { %798 = vsyncpa [#allocation3 + $0x1], 1 }
 0x3bf   :  { %799 = vsyncpa [#allocation6], 1 }
 0x3c0   :  { %800 = vsyncpa [#allocation9], 1 }
 0x3c1   :  { %801 = vsyncpa [#allocation12], 1 }
 0x3c2   :  { %802 = vsyncpa [#allocation15], 1 }
 0x3c3   :  { %803 = vsyncpa [#allocation4], 1 }
 0x3c4   :  { %805 = vsyncpa [#allocation4 + $0x1], 1 }

</bundles_post_ra>
